<compile_context>
chip_gen: v7x
topology: tpu7x:2x2x1
jax: 0.10.0
libtpu: 0.0.40
codegen_flags: <defaults>
</compile_context>

<pallas_src>
from functools import partial

import numpy as np
import jax
import jax.numpy as jnp
from jax.experimental import pallas as pl
from jax.experimental.pallas import tpu as pltpu

# ---- small synthetic config (llama-style DecoderModel) ----
HIDDEN = 128
N_HEADS = 4
HEAD_DIM = HIDDEN // N_HEADS          # 32
HALF = HEAD_DIM // 2                  # 16
INTER = 256
VOCAB = 256
N_LAYERS = 2
EPS = 1e-6
DTYPE = jnp.bfloat16                  # pretrained_config.torch_dtype
SOFTMAX_APPROX_RECIP = True           # set False for tight logit-equality validation


# ----------------------------- Pallas kernels -------------------------------

def _rmsnorm_f32(x, w):
    # x fp32 [T, H], w fp32 [1, H] -> fp32 [T, H]
    var = jnp.mean(x * x, axis=-1, keepdims=True)
    return x * jax.lax.rsqrt(var + EPS) * w


def _decoder_layer_kernel(h_ref, in_ln_ref, post_ln_ref, wproj_ref, wo3_ref,
                          wgu_ref, wd_ref, cos_ref, sin_ref,
                          segr_ref, segc_ref, o_ref):
    T = h_ref.shape[0]
    cdt = wproj_ref.dtype                          # compute (weight) dtype: bf16
    h = h_ref[...]                                 # fp32 residual stream (T, HIDDEN)

    # causal + same-segment predicate, kept boolean (never a dense fp32 bias)
    row = jax.lax.broadcasted_iota(jnp.int32, (T, T), 0)
    col = jax.lax.broadcasted_iota(jnp.int32, (T, T), 1)
    allowed = jnp.logical_and(segr_ref[...] == segc_ref[...], col <= row)   # (T, T) bool

    # ---- self-attention block ----
    x = _rmsnorm_f32(h, in_ln_ref[...].astype(jnp.float32)).astype(cdt)     # (T, C)
    # packed head-major projections: [Wq | Wk | Wv | Wq_rot | Wk_rot], each (N_HEADS, C, D).
    # rotate-half is folded into Wq_rot/Wk_rot columns, so RoPE below is pure elementwise.
    xb = jnp.broadcast_to(x[None], (5 * N_HEADS, T, HIDDEN))
    proj = jnp.einsum('htc,hcd->htd', xb, wproj_ref[...],
                      preferred_element_type=jnp.float32)                   # (5*Hh, T, D)

    cosd = cos_ref[...]                            # (T, D) fp32 = [cos | cos]
    sind = sin_ref[...]                            # (T, D) fp32 = [sin | sin]
    q3 = proj[0 * N_HEADS:1 * N_HEADS] * cosd + proj[3 * N_HEADS:4 * N_HEADS] * sind
    k3 = proj[1 * N_HEADS:2 * N_HEADS] * cosd + proj[4 * N_HEADS:5 * N_HEADS] * sind
    v3 = proj[2 * N_HEADS:3 * N_HEADS]             # (Hh, T, D) each

    scale = 1.0 / float(np.sqrt(HEAD_DIM))
    s = jnp.einsum('hqd,hkd->hqk', q3.astype(cdt), k3.astype(cdt),
                   preferred_element_type=jnp.float32) * scale              # (Hh, T, T)
    s = jnp.where(allowed, s, -1e30)               # predicate select, allocation-free
    m = jnp.max(s, axis=-1, keepdims=True)
    p = jnp.exp(s - m)
    l = jnp.sum(p, axis=-1, keepdims=True)
    o3 = jnp.einsum('hqk,hkd->hqd', p.astype(cdt), v3.astype(cdt),
                    preferred_element_type=jnp.float32)                     # (Hh, T, D)
    o3 = o3 * pl.reciprocal(l, approx=SOFTMAX_APPROX_RECIP)

    # output projection without any transpose/reshape: sum_h o3[h] @ Wo[h]
    attn_out = jnp.einsum('htd,hdc->htc', o3.astype(cdt), wo3_ref[...],
                          preferred_element_type=jnp.float32)               # (Hh, T, C)
    h = h + jnp.sum(attn_out, axis=0)              # lane-dense (T, HIDDEN)

    # ---- MLP block (SwiGLU), gate & up fused into one matmul ----
    x2 = _rmsnorm_f32(h, post_ln_ref[...].astype(jnp.float32)).astype(cdt)
    gu = jnp.dot(x2, wgu_ref[...], preferred_element_type=jnp.float32)      # (T, 2*INTER)
    mid = (jax.nn.silu(gu[:, :INTER]) * gu[:, INTER:]).astype(cdt)          # 128-aligned slices
    h = h + jnp.dot(mid, wd_ref[...], preferred_element_type=jnp.float32)

    o_ref[...] = h


def decoder_layer(h, lp, cosd, sind, seg_row, seg_col):
    """Whole decoder layer fused into one pallas_call (weights ~0.35 MB bf16 -> VMEM)."""
    T = h.shape[0]
    flops = int(2 * T * HIDDEN * (5 * HIDDEN + HIDDEN + 2 * INTER + INTER)
                + 4 * N_HEADS * T * T * HEAD_DIM)
    trans = int(N_HEADS * T * T + 2 * T * INTER + 2 * T)
    bytes_acc = int(2 * 4 * T * HIDDEN
                    + 2 * (5 * N_HEADS * HIDDEN * HEAD_DIM + N_HEADS * HEAD_DIM * HIDDEN
                           + HIDDEN * 2 * INTER + INTER * HIDDEN)
                    + 2 * 4 * T * HEAD_DIM + 8 * T)
    # TODO(synk): at production sizes (T in the thousands, hidden 4k+) this needs a
    #             "parallel" query-tile grid (2 TCs on v7x), flash-style KV tiling so the
    #             (T,T) scores never materialize, fp32 scratch accumulators, and an explicit
    #             vmem_limit_bytes derived against v7x's 64 MiB VMEM.
    return pl.pallas_call(
        _decoder_layer_kernel,
        out_shape=jax.ShapeDtypeStruct((T, HIDDEN), jnp.float32),
        cost_estimate=pl.CostEstimate(flops=flops, transcendentals=trans,
                                      bytes_accessed=bytes_acc),
    )(h, lp["input_ln"], lp["post_ln"], lp["wproj"], lp["wo3"],
      lp["wgu"], lp["wd"], cosd, sind, seg_row, seg_col)


def _lmhead_kernel(x_ref, nw_ref, embt_ref, o_ref):
    # fused final RMSNorm + tied-embedding lm_head; embt block is [HIDDEN, tv] (pre-transposed
    # once at init -> no in-kernel transpose / dim-1 contraction relayout).
    x = x_ref[...]                                                   # fp32 (Mp, H)
    xn = _rmsnorm_f32(x, nw_ref[...].astype(jnp.float32)).astype(embt_ref.dtype)
    o_ref[...] = jnp.dot(xn, embt_ref[...], preferred_element_type=jnp.float32)


def lm_head(h, norm_w, embed_t, tv=256):
    """h: fp32 [M, HIDDEN]; embed_t: bf16 [HIDDEN, VOCAB] -> fp32 logits [M, VOCAB].
    tv=256 fills the 256-wide MXU N on v6e/v7x and collapses the grid to 1 program here;
    on v5e tv=128 already fills N — at these sizes the difference is negligible."""
    M, H = h.shape
    V = embed_t.shape[1]
    if V % tv != 0:
        tv = V
    Mp = max(8, ((M + 7) // 8) * 8)                 # pad rows to a full sublane group
    if Mp != M:
        h = jnp.pad(h, ((0, Mp - M), (0, 0)))
    out = pl.pallas_call(
        _lmhead_kernel,
        out_shape=jax.ShapeDtypeStruct((Mp, V), jnp.float32),
        grid_spec=pltpu.PrefetchScalarGridSpec(
            num_scalar_prefetch=0,
            grid=(V // tv,),
            in_specs=[
                pl.BlockSpec((Mp, H), lambda j: (0, 0)),
                pl.BlockSpec((1, H), lambda j: (0, 0)),
                pl.BlockSpec((H, tv), lambda j: (0, j)),
            ],
            out_specs=pl.BlockSpec((Mp, tv), lambda j: (0, j)),
        ),
        compiler_params=pltpu.CompilerParams(dimension_semantics=("parallel",)),
        cost_estimate=pl.CostEstimate(flops=int(2 * Mp * H * V),
                                      transcendentals=int(Mp),
                                      bytes_accessed=int(4 * Mp * H + 2 * H * V + 4 * Mp * V)),
    )(h, norm_w, embed_t)
    return out[:M] if Mp != M else out


# ------------------------------- model forward --------------------------------

@partial(jax.jit, static_argnames=("return_context_logits",))
def _forward(params, input_ids, position_ids, seg_row, seg_col, last_idx,
             return_context_logits=False):
    # DecoderModel.forward: embed_tokens gather (plain JAX); residual stream kept fp32.
    h = jnp.take(params["embed"], input_ids, axis=0).astype(jnp.float32)

    # RoPE cos/sin tables (shared across layers), per-head layout [cos|cos]/[sin|sin]: (T, D)
    inv_freq = 1.0 / (10000.0 ** (jnp.arange(HALF, dtype=jnp.float32) / HALF))
    freqs = position_ids.astype(jnp.float32)[:, None] * inv_freq[None, :]
    cosd = jnp.concatenate([jnp.cos(freqs), jnp.cos(freqs)], axis=-1)
    sind = jnp.concatenate([jnp.sin(freqs), jnp.sin(freqs)], axis=-1)

    for lp in params["layers"]:
        h = decoder_layer(h, lp, cosd, sind, seg_row, seg_col)

    # LogitsProcessor.forward (final RMSNorm fused into the lm_head kernel; it commutes
    # with the token-wise last-token gather). tie_word_embeddings=True.
    if not return_context_logits:
        h = h[last_idx]
    return lm_head(h, params["final_norm"], params["embed_t"])


def decoder_model_for_causal_lm(params, input_ids, position_ids, seq_lens_np,
                                return_context_logits=False):
    T = int(input_ids.shape[0])
    # attn_metadata -> tiny segment-id vectors; the (T,T) mask is built inside the kernel
    seg = np.repeat(np.arange(len(seq_lens_np), dtype=np.int32), seq_lens_np)
    seg_row = jnp.asarray(seg.reshape(T, 1))
    seg_col = jnp.asarray(seg.reshape(1, T))
    last_idx = jnp.asarray((np.cumsum(seq_lens_np) - 1).astype(np.int32))
    return _forward(params, input_ids, position_ids, seg_row, seg_col, last_idx,
                    return_context_logits=return_context_logits)


# ------------------------------- params --------------------------------------

def _per_head(w):
    # (HIDDEN, N_HEADS*HEAD_DIM) -> (N_HEADS, HIDDEN, HEAD_DIM)
    return jnp.transpose(w.reshape(HIDDEN, N_HEADS, HEAD_DIM), (1, 0, 2))


def _rot_fold(w3):
    # fold rotate-half into the output columns: x @ w_rot == rotate_half(x @ w) per head
    return jnp.concatenate([-w3[..., HALF:], w3[..., :HALF]], axis=-1)


def init_params(key):
    def nrm(k, shape, scale=0.02):
        return (jax.random.normal(k, shape, dtype=jnp.float32) * scale).astype(DTYPE)

    keys = jax.random.split(key, 1 + N_LAYERS * 7)
    embed = nrm(keys[0], (VOCAB, HIDDEN))
    params = {
        "embed": embed,
        "embed_t": jnp.transpose(embed),                   # [HIDDEN, VOCAB], built once
        "final_norm": jnp.ones((1, HIDDEN), dtype=DTYPE),  # pre-shaped (1, H)
        "layers": [],
    }
    for i in range(N_LAYERS):
        k = keys[1 + 7 * i: 1 + 7 * (i + 1)]
        wq, wk, wv, wo = (nrm(k[j], (HIDDEN, HIDDEN)) for j in range(4))
        wg, wu = nrm(k[4], (HIDDEN, INTER)), nrm(k[5], (HIDDEN, INTER))
        wd = nrm(k[6], (INTER, HIDDEN))
        wq3, wk3, wv3 = _per_head(wq), _per_head(wk), _per_head(wv)
        params["layers"].append({
            "input_ln": jnp.ones((1, HIDDEN), dtype=DTYPE),
            "post_ln": jnp.ones((1, HIDDEN), dtype=DTYPE),
            # packed head-major projections [Wq|Wk|Wv|Wq_rot|Wk_rot]: (5*Hh, HIDDEN, HEAD_DIM)
            "wproj": jnp.concatenate([wq3, wk3, wv3, _rot_fold(wq3), _rot_fold(wk3)], axis=0),
            "wo3": wo.reshape(N_HEADS, HEAD_DIM, HIDDEN),
            "wgu": jnp.concatenate([wg, wu], axis=1),       # (HIDDEN, 2*INTER)
            "wd": wd,
        })
    return params
    # TODO(synk): load_weights / duplicate_kv_weight (checkpoint remap + KV-head replication
    #             for TP) and quantization hooks have no Pallas equivalent; weights are synthetic.


# --------------------------------- main ---------------------------------------

if __name__ == "__main__":
    key = jax.random.PRNGKey(0)
    params = init_params(key)

    # attn_metadata: two packed sequences of lengths 5 and 3 (total 8 tokens)
    seq_lens = np.array([5, 3], dtype=np.int32)
    total_tokens = int(seq_lens.sum())
    input_ids = jax.random.randint(jax.random.PRNGKey(1), (total_tokens,), 0, VOCAB,
                                   dtype=jnp.int32)
    position_ids = jnp.asarray(
        np.concatenate([np.arange(l) for l in seq_lens]).astype(np.int32))

    logits = decoder_model_for_causal_lm(params, input_ids, position_ids, seq_lens,
                                         return_context_logits=False)
    logits = jax.block_until_ready(logits)

    assert logits.shape == (len(seq_lens), VOCAB)
    assert logits.dtype == jnp.float32
    assert bool(jnp.all(jnp.isfinite(logits)))

    # also exercise the return_context_logits=True path (context logits for every token)
    ctx_logits = jax.block_until_ready(
        decoder_model_for_causal_lm(params, input_ids, position_ids, seq_lens,
                                    return_context_logits=True))
    assert ctx_logits.shape == (total_tokens, VOCAB)
    assert bool(jnp.all(jnp.isfinite(ctx_logits)))

    print("KERNEL_OK")
</pallas_src>

<mosaic_0001>
module attributes {stable_mosaic.version = 11 : i64} {
  func.func @_decoder_layer_kernel(%arg0: memref<8x128xf32, #tpu.memory_space<vmem>>, %arg1: memref<1x128xbf16, #tpu.memory_space<vmem>>, %arg2: memref<1x128xbf16, #tpu.memory_space<vmem>>, %arg3: memref<20x128x32xbf16, #tpu.memory_space<vmem>>, %arg4: memref<4x32x128xbf16, #tpu.memory_space<vmem>>, %arg5: memref<128x512xbf16, #tpu.memory_space<vmem>>, %arg6: memref<256x128xbf16, #tpu.memory_space<vmem>>, %arg7: memref<8x32xf32, #tpu.memory_space<vmem>>, %arg8: memref<8x32xf32, #tpu.memory_space<vmem>>, %arg9: memref<8x1xi32, #tpu.memory_space<vmem>>, %arg10: memref<1x8xi32, #tpu.memory_space<vmem>>, %arg11: memref<8x128xf32, #tpu.memory_space<vmem>>) attributes {dimension_semantics = [], scalar_prefetch = 0 : i64, scratch_operands = 0 : i64, tpu.core_type = #tpu.core_type<tc>} {
    %c0 = arith.constant 0 : index
    %c0_0 = arith.constant 0 : index
    %0 = vector.load %arg0[%c0, %c0_0] : memref<8x128xf32, #tpu.memory_space<vmem>>, vector<8x128xf32>
    %1 = tpu.iota {dimensions = array<i32: 0>} : vector<8x8xi32>
    %2 = tpu.iota {dimensions = array<i32: 1>} : vector<8x8xi32>
    %c0_1 = arith.constant 0 : index
    %c0_2 = arith.constant 0 : index
    %3 = vector.load %arg9[%c0_1, %c0_2] : memref<8x1xi32, #tpu.memory_space<vmem>>, vector<8x1xi32>
    %c0_3 = arith.constant 0 : index
    %c0_4 = arith.constant 0 : index
    %4 = vector.load %arg10[%c0_3, %c0_4] : memref<1x8xi32, #tpu.memory_space<vmem>>, vector<1x8xi32>
    %5 = vector.broadcast %3 : vector<8x1xi32> to vector<8x8xi32>
    %6 = vector.broadcast %4 : vector<1x8xi32> to vector<8x8xi32>
    %7 = arith.cmpi eq, %5, %6 : vector<8x8xi32>
    %8 = arith.cmpi sle, %2, %1 : vector<8x8xi32>
    %9 = arith.andi %7, %8 : vector<8x8xi1>
    %c0_5 = arith.constant 0 : index
    %c0_6 = arith.constant 0 : index
    %10 = vector.load %arg1[%c0_5, %c0_6] : memref<1x128xbf16, #tpu.memory_space<vmem>>, vector<1x128xbf16>
    %11 = arith.extf %10 : vector<1x128xbf16> to vector<1x128xf32>
    %12 = arith.mulf %0, %0 : vector<8x128xf32>
    %cst = arith.constant dense<0.000000e+00> : vector<8xf32>
    %13 = vector.multi_reduction <add>, %12, %cst [1] : vector<8x128xf32> to vector<8xf32>
    %14 = vector.shape_cast %13 : vector<8xf32> to vector<8x1xf32>
    %cst_7 = arith.constant 1.280000e+02 : f32
    %15 = vector.broadcast %cst_7 : f32 to vector<8x1xf32>
    %16 = arith.divf %14, %15 : vector<8x1xf32>
    %cst_8 = arith.constant 9.99999997E-7 : f32
    %17 = vector.broadcast %cst_8 : f32 to vector<8x1xf32>
    %18 = arith.addf %16, %17 : vector<8x1xf32>
    %19 = math.rsqrt %18 : vector<8x1xf32>
    %20 = vector.broadcast %19 : vector<8x1xf32> to vector<8x128xf32>
    %21 = arith.mulf %0, %20 : vector<8x128xf32>
    %22 = vector.broadcast %11 : vector<1x128xf32> to vector<8x128xf32>
    %23 = arith.mulf %21, %22 : vector<8x128xf32>
    %24 = arith.truncf %23 : vector<8x128xf32> to vector<8x128xbf16>
    %25 = vector.shape_cast %24 : vector<8x128xbf16> to vector<1x8x128xbf16>
    %26 = vector.shape_cast %25 : vector<1x8x128xbf16> to vector<1x8x128xbf16>
    %27 = vector.broadcast %26 : vector<1x8x128xbf16> to vector<20x8x128xbf16>
    %c0_9 = arith.constant 0 : index
    %c0_10 = arith.constant 0 : index
    %c0_11 = arith.constant 0 : index
    %28 = vector.load %arg3[%c0_9, %c0_10, %c0_11] : memref<20x128x32xbf16, #tpu.memory_space<vmem>>, vector<20x128x32xbf16>
    "tpu.trace_start"() <{level = 10 : i32, message = "htc,hcd->htd"}> : () -> ()
    %cst_12 = arith.constant dense<0.000000e+00> : vector<20x8x32xf32>
    %29 = tpu.matmul %27, %28, %cst_12 {dimension_numbers = #tpu.dot_dimension_numbers<[2], [1], [1], [2], [0, 0, 0, 1, 1, 2], [0], [0]>} : vector<20x8x128xbf16>, vector<20x128x32xbf16>, vector<20x8x32xf32> -> vector<20x8x32xf32>
    "tpu.trace_stop"() : () -> ()
    %c0_13 = arith.constant 0 : index
    %c0_14 = arith.constant 0 : index
    %30 = vector.load %arg7[%c0_13, %c0_14] : memref<8x32xf32, #tpu.memory_space<vmem>>, vector<8x32xf32>
    %c0_15 = arith.constant 0 : index
    %c0_16 = arith.constant 0 : index
    %31 = vector.load %arg8[%c0_15, %c0_16] : memref<8x32xf32, #tpu.memory_space<vmem>>, vector<8x32xf32>
    %32 = vector.extract_strided_slice %29 {offsets = [0, 0, 0], sizes = [4, 8, 32], strides = [1, 1, 1]} : vector<20x8x32xf32> to vector<4x8x32xf32>
    %33 = vector.shape_cast %30 : vector<8x32xf32> to vector<1x8x32xf32>
    %34 = vector.broadcast %33 : vector<1x8x32xf32> to vector<4x8x32xf32>
    %35 = arith.mulf %32, %34 : vector<4x8x32xf32>
    %36 = vector.extract_strided_slice %29 {offsets = [12, 0, 0], sizes = [4, 8, 32], strides = [1, 1, 1]} : vector<20x8x32xf32> to vector<4x8x32xf32>
    %37 = vector.shape_cast %31 : vector<8x32xf32> to vector<1x8x32xf32>
    %38 = vector.broadcast %37 : vector<1x8x32xf32> to vector<4x8x32xf32>
    %39 = arith.mulf %36, %38 : vector<4x8x32xf32>
    %40 = arith.addf %35, %39 : vector<4x8x32xf32>
    %41 = vector.extract_strided_slice %29 {offsets = [4, 0, 0], sizes = [4, 8, 32], strides = [1, 1, 1]} : vector<20x8x32xf32> to vector<4x8x32xf32>
    %42 = vector.shape_cast %30 : vector<8x32xf32> to vector<1x8x32xf32>
    %43 = vector.broadcast %42 : vector<1x8x32xf32> to vector<4x8x32xf32>
    %44 = arith.mulf %41, %43 : vector<4x8x32xf32>
    %45 = vector.extract_strided_slice %29 {offsets = [16, 0, 0], sizes = [4, 8, 32], strides = [1, 1, 1]} : vector<20x8x32xf32> to vector<4x8x32xf32>
    %46 = vector.shape_cast %31 : vector<8x32xf32> to vector<1x8x32xf32>
    %47 = vector.broadcast %46 : vector<1x8x32xf32> to vector<4x8x32xf32>
    %48 = arith.mulf %45, %47 : vector<4x8x32xf32>
    %49 = arith.addf %44, %48 : vector<4x8x32xf32>
    %50 = vector.extract_strided_slice %29 {offsets = [8, 0, 0], sizes = [4, 8, 32], strides = [1, 1, 1]} : vector<20x8x32xf32> to vector<4x8x32xf32>
    %51 = arith.truncf %40 : vector<4x8x32xf32> to vector<4x8x32xbf16>
    %52 = arith.truncf %49 : vector<4x8x32xf32> to vector<4x8x32xbf16>
    "tpu.trace_start"() <{level = 10 : i32, message = "hqd,hkd->hqk"}> : () -> ()
    %cst_17 = arith.constant dense<0.000000e+00> : vector<4x8x8xf32>
    %53 = tpu.matmul %51, %52, %cst_17 {dimension_numbers = #tpu.dot_dimension_numbers<[2], [2], [1], [1], [0, 0, 0, 1, 1, 1], [0], [0]>} : vector<4x8x32xbf16>, vector<4x8x32xbf16>, vector<4x8x8xf32> -> vector<4x8x8xf32>
    "tpu.trace_stop"() : () -> ()
    %cst_18 = arith.constant 0.176776692 : f32
    %54 = vector.broadcast %cst_18 : f32 to vector<4x8x8xf32>
    %55 = arith.mulf %53, %54 : vector<4x8x8xf32>
    %cst_19 = arith.constant -1.000000e+30 : f32
    %56 = vector.shape_cast %9 : vector<8x8xi1> to vector<1x8x8xi1>
    %57 = vector.broadcast %56 : vector<1x8x8xi1> to vector<4x8x8xi1>
    %58 = vector.broadcast %cst_19 : f32 to vector<4x8x8xf32>
    %59 = arith.select %57, %55, %58 : vector<4x8x8xi1>, vector<4x8x8xf32>
    %cst_20 = arith.constant dense<0xFF800000> : vector<4x8xf32>
    %60 = vector.multi_reduction <maximumf>, %59, %cst_20 [2] : vector<4x8x8xf32> to vector<4x8xf32>
    %61 = vector.shape_cast %60 : vector<4x8xf32> to vector<4x8x1xf32>
    %62 = vector.broadcast %61 : vector<4x8x1xf32> to vector<4x8x8xf32>
    %63 = arith.subf %59, %62 : vector<4x8x8xf32>
    %64 = math.exp %63 : vector<4x8x8xf32>
    %cst_21 = arith.constant dense<0.000000e+00> : vector<4x8xf32>
    %65 = vector.multi_reduction <add>, %64, %cst_21 [2] : vector<4x8x8xf32> to vector<4x8xf32>
    %66 = vector.shape_cast %65 : vector<4x8xf32> to vector<4x8x1xf32>
    %67 = arith.truncf %64 : vector<4x8x8xf32> to vector<4x8x8xbf16>
    %68 = arith.truncf %50 : vector<4x8x32xf32> to vector<4x8x32xbf16>
    "tpu.trace_start"() <{level = 10 : i32, message = "hqk,hkd->hqd"}> : () -> ()
    %cst_22 = arith.constant dense<0.000000e+00> : vector<4x8x32xf32>
    %69 = tpu.matmul %67, %68, %cst_22 {dimension_numbers = #tpu.dot_dimension_numbers<[2], [1], [1], [2], [0, 0, 0, 1, 1, 2], [0], [0]>} : vector<4x8x8xbf16>, vector<4x8x32xbf16>, vector<4x8x32xf32> -> vector<4x8x32xf32>
    "tpu.trace_stop"() : () -> ()
    %70 = tpu.reciprocal %66 {approx = true} : vector<4x8x1xf32> -> vector<4x8x1xf32>
    %71 = vector.broadcast %70 : vector<4x8x1xf32> to vector<4x8x32xf32>
    %72 = arith.mulf %69, %71 : vector<4x8x32xf32>
    %73 = arith.truncf %72 : vector<4x8x32xf32> to vector<4x8x32xbf16>
    %c0_23 = arith.constant 0 : index
    %c0_24 = arith.constant 0 : index
    %c0_25 = arith.constant 0 : index
    %74 = vector.load %arg4[%c0_23, %c0_24, %c0_25] : memref<4x32x128xbf16, #tpu.memory_space<vmem>>, vector<4x32x128xbf16>
    "tpu.trace_start"() <{level = 10 : i32, message = "htd,hdc->htc"}> : () -> ()
    %cst_26 = arith.constant dense<0.000000e+00> : vector<4x8x128xf32>
    %75 = tpu.matmul %73, %74, %cst_26 {dimension_numbers = #tpu.dot_dimension_numbers<[2], [1], [1], [2], [0, 0, 0, 1, 1, 2], [0], [0]>} : vector<4x8x32xbf16>, vector<4x32x128xbf16>, vector<4x8x128xf32> -> vector<4x8x128xf32>
    "tpu.trace_stop"() : () -> ()
    %cst_27 = arith.constant dense<0.000000e+00> : vector<8x128xf32>
    %76 = vector.multi_reduction <add>, %75, %cst_27 [0] : vector<4x8x128xf32> to vector<8x128xf32>
    %77 = arith.addf %0, %76 : vector<8x128xf32>
    %c0_28 = arith.constant 0 : index
    %c0_29 = arith.constant 0 : index
    %78 = vector.load %arg2[%c0_28, %c0_29] : memref<1x128xbf16, #tpu.memory_space<vmem>>, vector<1x128xbf16>
    %79 = arith.extf %78 : vector<1x128xbf16> to vector<1x128xf32>
    %80 = arith.mulf %77, %77 : vector<8x128xf32>
    %cst_30 = arith.constant dense<0.000000e+00> : vector<8xf32>
    %81 = vector.multi_reduction <add>, %80, %cst_30 [1] : vector<8x128xf32> to vector<8xf32>
    %82 = vector.shape_cast %81 : vector<8xf32> to vector<8x1xf32>
    %cst_31 = arith.constant 1.280000e+02 : f32
    %83 = vector.broadcast %cst_31 : f32 to vector<8x1xf32>
    %84 = arith.divf %82, %83 : vector<8x1xf32>
    %cst_32 = arith.constant 9.99999997E-7 : f32
    %85 = vector.broadcast %cst_32 : f32 to vector<8x1xf32>
    %86 = arith.addf %84, %85 : vector<8x1xf32>
    %87 = math.rsqrt %86 : vector<8x1xf32>
    %88 = vector.broadcast %87 : vector<8x1xf32> to vector<8x128xf32>
    %89 = arith.mulf %77, %88 : vector<8x128xf32>
    %90 = vector.broadcast %79 : vector<1x128xf32> to vector<8x128xf32>
    %91 = arith.mulf %89, %90 : vector<8x128xf32>
    %92 = arith.truncf %91 : vector<8x128xf32> to vector<8x128xbf16>
    %c0_33 = arith.constant 0 : index
    %c0_34 = arith.constant 0 : index
    %93 = vector.load %arg5[%c0_33, %c0_34] : memref<128x512xbf16, #tpu.memory_space<vmem>>, vector<128x512xbf16>
    %cst_35 = arith.constant dense<0.000000e+00> : vector<8x512xf32>
    %94 = tpu.matmul %92, %93, %cst_35 {dimension_numbers = #tpu.dot_dimension_numbers<[1], [0], [0], [1], [0, 0, 1, 1], [], []>} : vector<8x128xbf16>, vector<128x512xbf16>, vector<8x512xf32> -> vector<8x512xf32>
    %95 = vector.extract_strided_slice %94 {offsets = [0, 0], sizes = [8, 256], strides = [1, 1]} : vector<8x512xf32> to vector<8x256xf32>
    %96 = arith.negf %95 : vector<8x256xf32>
    %97 = math.exp %96 : vector<8x256xf32>
    %cst_36 = arith.constant 1.000000e+00 : f32
    %98 = vector.broadcast %cst_36 : f32 to vector<8x256xf32>
    %99 = arith.addf %98, %97 : vector<8x256xf32>
    %100 = arith.divf %98, %99 : vector<8x256xf32>
    %101 = arith.mulf %95, %100 : vector<8x256xf32>
    %102 = vector.extract_strided_slice %94 {offsets = [0, 256], sizes = [8, 256], strides = [1, 1]} : vector<8x512xf32> to vector<8x256xf32>
    %103 = arith.mulf %101, %102 : vector<8x256xf32>
    %104 = arith.truncf %103 : vector<8x256xf32> to vector<8x256xbf16>
    %c0_37 = arith.constant 0 : index
    %c0_38 = arith.constant 0 : index
    %105 = vector.load %arg6[%c0_37, %c0_38] : memref<256x128xbf16, #tpu.memory_space<vmem>>, vector<256x128xbf16>
    %cst_39 = arith.constant dense<0.000000e+00> : vector<8x128xf32>
    %106 = tpu.matmul %104, %105, %cst_39 {dimension_numbers = #tpu.dot_dimension_numbers<[1], [0], [0], [1], [0, 0, 1, 1], [], []>} : vector<8x256xbf16>, vector<256x128xbf16>, vector<8x128xf32> -> vector<8x128xf32>
    %107 = arith.addf %77, %106 : vector<8x128xf32>
    %c0_40 = arith.constant 0 : index
    %c0_41 = arith.constant 0 : index
    %108 = vector.load %arg11[%c0_40, %c0_41] : memref<8x128xf32, #tpu.memory_space<vmem>>, vector<8x128xf32>
    tpu.vector_store %arg11[%c0_40, %c0_41], %107 {strides = array<i32>} : memref<8x128xf32, #tpu.memory_space<vmem>>, vector<8x128xf32>,
    return
  }
}

module attributes {stable_mosaic.version = 11 : i64} {
  func.func @_lmhead_kernel(%arg0: i32, %arg1: memref<8x128xf32, #tpu.memory_space<vmem>>, %arg2: memref<1x128xbf16, #tpu.memory_space<vmem>>, %arg3: memref<128x256xbf16, #tpu.memory_space<vmem>>, %arg4: memref<8x256xf32, #tpu.memory_space<vmem>>) attributes {dimension_semantics = [#tpu.dimension_semantics<parallel>], iteration_bounds = array<i64: 1>, scalar_prefetch = 0 : i64, scratch_operands = 0 : i64, tpu.core_type = #tpu.core_type<tc>, window_params = [{pipeline_mode = #tpu.pipeline_mode<synchronous>, transform_indices = @transform_0, window_bounds = array<i64: 8, 128>}, {pipeline_mode = #tpu.pipeline_mode<synchronous>, transform_indices = @transform_1, window_bounds = array<i64: 1, 128>}, {transform_indices = @transform_2, window_bounds = array<i64: 128, 256>}, {transform_indices = @transform_3, window_bounds = array<i64: 8, 256>}]} {
    %c0 = arith.constant 0 : index
    %c0_0 = arith.constant 0 : index
    %0 = vector.load %arg1[%c0, %c0_0] : memref<8x128xf32, #tpu.memory_space<vmem>>, vector<8x128xf32>
    %c0_1 = arith.constant 0 : index
    %c0_2 = arith.constant 0 : index
    %1 = vector.load %arg2[%c0_1, %c0_2] : memref<1x128xbf16, #tpu.memory_space<vmem>>, vector<1x128xbf16>
    %2 = arith.extf %1 : vector<1x128xbf16> to vector<1x128xf32>
    %3 = arith.mulf %0, %0 : vector<8x128xf32>
    %cst = arith.constant dense<0.000000e+00> : vector<8xf32>
    %4 = vector.multi_reduction <add>, %3, %cst [1] : vector<8x128xf32> to vector<8xf32>
    %5 = vector.shape_cast %4 : vector<8xf32> to vector<8x1xf32>
    %cst_3 = arith.constant 1.280000e+02 : f32
    %6 = vector.broadcast %cst_3 : f32 to vector<8x1xf32>
    %7 = arith.divf %5, %6 : vector<8x1xf32>
    %cst_4 = arith.constant 9.99999997E-7 : f32
    %8 = vector.broadcast %cst_4 : f32 to vector<8x1xf32>
    %9 = arith.addf %7, %8 : vector<8x1xf32>
    %10 = math.rsqrt %9 : vector<8x1xf32>
    %11 = vector.broadcast %10 : vector<8x1xf32> to vector<8x128xf32>
    %12 = arith.mulf %0, %11 : vector<8x128xf32>
    %13 = vector.broadcast %2 : vector<1x128xf32> to vector<8x128xf32>
    %14 = arith.mulf %12, %13 : vector<8x128xf32>
    %15 = arith.truncf %14 : vector<8x128xf32> to vector<8x128xbf16>
    %c0_5 = arith.constant 0 : index
    %c0_6 = arith.constant 0 : index
    %16 = vector.load %arg3[%c0_5, %c0_6] : memref<128x256xbf16, #tpu.memory_space<vmem>>, vector<128x256xbf16>
    %cst_7 = arith.constant dense<0.000000e+00> : vector<8x256xf32>
    %17 = tpu.matmul %15, %16, %cst_7 {dimension_numbers = #tpu.dot_dimension_numbers<[1], [0], [0], [1], [0, 0, 1, 1], [], []>} : vector<8x128xbf16>, vector<128x256xbf16>, vector<8x256xf32> -> vector<8x256xf32>
    %c0_8 = arith.constant 0 : index
    %c0_9 = arith.constant 0 : index
    %18 = vector.load %arg4[%c0_8, %c0_9] : memref<8x256xf32, #tpu.memory_space<vmem>>, vector<8x256xf32>
    tpu.vector_store %arg4[%c0_8, %c0_9], %17 {strides = array<i32>} : memref<8x256xf32, #tpu.memory_space<vmem>>, vector<8x256xf32>,
    return
  }
  func.func @transform_0(%arg0: i32) -> (i32, i32) {
    %c0_i32 = arith.constant 0 : i32
    %c0_i32_0 = arith.constant 0 : i32
    %c0_i32_1 = arith.constant 0 : i32
    return %c0_i32, %c0_i32_0 : i32, i32
  }
  func.func @transform_1(%arg0: i32) -> (i32, i32) {
    %c0_i32 = arith.constant 0 : i32
    %c0_i32_0 = arith.constant 0 : i32
    %c0_i32_1 = arith.constant 0 : i32
    return %c0_i32, %c0_i32_0 : i32, i32
  }
  func.func @transform_2(%arg0: i32) -> (i32, i32) {
    %c0_i32 = arith.constant 0 : i32
    %c0_i32_0 = arith.constant 0 : i32
    return %c0_i32, %arg0 : i32, i32
  }
  func.func @transform_3(%arg0: i32) -> (i32, i32) {
    %c0_i32 = arith.constant 0 : i32
    %c0_i32_0 = arith.constant 0 : i32
    return %c0_i32, %arg0 : i32, i32
  }
}

</mosaic_0001>

<bundles_post_ra>
// kernel: _forward.5
= control target key start
LH: loop header
LB: loop body
LE: loop exit
PB: predicated region body
PF: predicated region fallthrough
CT: control target
= control target key end

     0   :  { %v218_v15 = vmov 0   ;;  %v26_v21 = vlaneseq  ;;  %s299_s0 = inlined_call_operand.vmem [shape: f32[8,128], index: 0, kind: input, shape index: {}]   ;;  %s300_s2 = inlined_call_operand.vmem [shape: bf16[128,256], index: 2, kind: input, shape index: {}]   ;;  %s301_s1 = inlined_call_operand.vmem [shape: bf16[1,128], index: 1, kind: input, shape index: {}]   ;;  %s302_s3 = inlined_call_operand.vmem [shape: f32[8,256], index: 3, kind: output, shape index: {}]  }
   0x1   :  { %v15_v0 = vld [vmem:[%s299_s0] sm:$0xff]  ;;  %v195_v4 = vld [vmem:[%s300_s2 + $0x14] ss:$8 sps:$4 sm:$0xff]   ;;  %v197_v5 = vld [vmem:[%s300_s2 + $0x10] ss:$8 sps:$4 sm:$0xff]   ;;  %160 = vmatprep.mubr.bf16.mxu0 %v218_v15 }
   0x2   :  { %v18_v1 = vmul.f32 %v15_v0, %v15_v0  ;;  %v192_v2 = vld [vmem:[%s300_s2 + $0x4] ss:$8 sps:$4 sm:$0xff]   ;;  %v194_v3 = vld [vmem:[%s300_s2] ss:$8 sps:$4 sm:$0xff]   ;;  %v201_v8 = vld [vmem:[%s300_s2 + $0x34] ss:$8 sps:$4 sm:$0xff]  }
   0x3   :  { %128 = vmatprep.subr.bf16.mxu0 %v192_v2  ;;  %v198_v6 = vld [vmem:[%s300_s2 + $0x24] ss:$8 sps:$4 sm:$0xff]   ;;  %v200_v7 = vld [vmem:[%s300_s2 + $0x20] ss:$8 sps:$4 sm:$0xff]   ;;  %v203_v9 = vld [vmem:[%s300_s2 + $0x30] ss:$8 sps:$4 sm:$0xff]  }
   0x4   :  { %19 = vadd.xlane.f32.xlu0 %v18_v1  ;;  %129 = vmatpush1.bf16.msra.mxu0 %v194_v3  ;;  %v204_v10 = vld [vmem:[%s300_s2 + $0x44] ss:$8 sps:$4 sm:$0xff]   ;;  %v206_v11 = vld [vmem:[%s300_s2 + $0x40] ss:$8 sps:$4 sm:$0xff]   ;;  %v207_v12 = vld [vmem:[%s300_s2 + $0x54] ss:$8 sps:$4 sm:$0xff]  }
   0x5   :  { %130 = vmatprep.subr.bf16.mxu0 %v195_v4  ;;  %v209_v13 = vld [vmem:[%s300_s2 + $0x50] ss:$8 sps:$4 sm:$0xff]   ;;  %v210_v14 = vld [vmem:[%s300_s2 + $0x64] ss:$8 sps:$4 sm:$0xff]   ;;  %v212_v16 = vld [vmem:[%s300_s2 + $0x60] ss:$8 sps:$4 sm:$0xff]  }
   0x6   :  { %v213_v17 = vld [vmem:[%s300_s2 + $0x74] ss:$8 sps:$4 sm:$0xff]   ;;  %v215_v18 = vld [vmem:[%s300_s2 + $0x70] ss:$8 sps:$4 sm:$0xff]   ;;  %v27_v23 = vshrl.u32 %v26_v21, 7 }
   0x7   :  { %v16_v24 = vld [vmem:[%s301_s1] sm:$0x1] }
   0x8   :  { %131 = vmatpush1.bf16.msra.mxu0 %v197_v5  ;;  %v17_v25 = vunpack.c.l.bf16 %v16_v24  ;;  %v28_v26 = vsub.s32 0, %v27_v23 }
   0x9   :  { %132 = vmatprep.subr.bf16.mxu0 %v198_v6 }
   0xa   :  { %v29_v27 = vrot.slane %v17_v25, %v28_v26 }
   0xc   :  { %133 = vmatpush1.bf16.msra.mxu0 %v200_v7 }
   0xd   :  { %134 = vmatprep.subr.bf16.mxu0 %v201_v8 }
  0x10   :  { %135 = vmatpush1.bf16.msra.mxu0 %v203_v9 }
  0x11   :  { %136 = vmatprep.subr.bf16.mxu0 %v204_v10 }
  0x14   :  { %137 = vmatpush1.bf16.msra.mxu0 %v206_v11 }
  0x15   :  { %138 = vmatprep.subr.bf16.mxu0 %v207_v12 }
  0x18   :  { %139 = vmatpush1.bf16.msra.mxu0 %v209_v13 }
  0x19   :  { %140 = vmatprep.subr.bf16.mxu0 %v210_v14 }
  0x1c   :  { %141 = vmatpush1.bf16.msra.mxu0 %v212_v16 }
  0x1d   :  { %142 = vmatprep.subr.bf16.mxu0 %v213_v17 }
  0x20   :  { %143 = vmatpush1.bf16.msra.mxu0 %v215_v18 }
  0x91   :  { %v20_v19 = vpop.xlane.xlu0 %19 }
  0x92   :  { %v22_v20 = vmul.f32 0.0078125, %v20_v19 }
  0x94   :  { %v23_v22 = vadd.f32 1e-06, %v22_v20 }
  0x96   :  { %216 = vrsqrt.f32 %v23_v22 }
  0xa0   :  { %v217_v28 = vpop.eup %216 }
  0xa1   :  { %v25_v29 = vmul.f32 %v217_v28, %v15_v0 }
  0xa3   :  { %v30_v30 = vmul.f32 %v29_v27, %v25_v29 }
  0xa5   :  { %v31_v31 = vpack.c.bf16 %v30_v30, %v30_v30 }
  0xa7   :  { %161 = vmatmul.mubr.bf16.vlgmr.msra.gmra.mrb[0].mxu0 %v31_v31 }
 0x17a   :  { %v162_v32 = vpop.f32.mrb[0].mxu0 }
 0x17b   :  { %169 = vst [vmem:[%s302_s3] sm:$0xff] %v162_v32  ;;  %v164_v33 = vpop.f32.mrb[1].mxu0 }
 0x17c   :  { %170 = vst [vmem:[%s302_s3 + $0x8] sm:$0xff] %v164_v33  ;;  %v166_v34 = vpop.f32.mrb[2].mxu0 }
 0x17d   :  { %v167_v35 = vpop.f32.mrb[3].mxu0 }

// kernel: _forward.3
= control target key start
LH: loop header
LB: loop body
LE: loop exit
PB: predicated region body
PF: predicated region fallthrough
CT: control target
= control target key end

     0   :  { %v4550_v1 = vmov 0.0   ;;  %vm4551_vm0 = vmmov 0   ;;  %v40_v21 = vlaneseq  ;;  %vm2429_vm1 = vcmask 1043456   ;;  %s5657_s0 = inlined_call_operand.vmem [shape: f32[8,128], index: 0, kind: input, shape index: {}]   ;;  %s5658_s3 = inlined_call_operand.vmem [shape: bf16[20,128,32], index: 3, kind: input, shape index: {}]   ;;  %s5659_s1 = inlined_call_operand.vmem [shape: bf16[1,128], index: 1, kind: input, shape index: {}]   ;;  %s5660_s9 = inlined_call_operand.vmem [shape: s32[8,1], index: 9, kind: input, shape index: {}]   ;;  %s5661_s7 = inlined_call_operand.vmem [shape: f32[8,32], index: 7, kind: input, shape index: {}]   ;;  %s5662_s8 = inlined_call_operand.vmem [shape: f32[8,32], index: 8, kind: input, shape index: {}]   ;;  %s5663_s10 = inlined_call_operand.vmem [shape: s32[1,8], index: 10, kind: input, shape index: {}]   ;;  %s5664_s4 = inlined_call_operand.vmem [shape: bf16[4,32,128], index: 4, kind: input, shape index: {}]   ;;  %s5665_s5 = inlined_call_operand.vmem [shape: bf16[128,512], index: 5, kind: input, shape index: {}]   ;;  %s5666_s2 = inlined_call_operand.vmem [shape: bf16[1,128], index: 2, kind: input, shape index: {}]   ;;  %s5667_s6 = inlined_call_operand.vmem [shape: bf16[256,128], index: 6, kind: input, shape index: {}]   ;;  %s5668_s11 = inlined_call_operand.vmem [shape: f32[8,128], index: 11, kind: output, shape index: {}]  }
   0x1   :  { %v4616_v0 = vld [vmem:[%s5657_s0] sm:$0xff]  ;;  %3805 = vmatprep.subr.bf16.mxu0 %v4550_v1  ;;  %3825 = vmatprep.subr.bf16.mxu1 %v4550_v1  ;;  %v4291_v5 = vld [vmem:[%s5658_s3 + $0x8] sm:$0xff]   ;;  %v4293_v7 = vld [vmem:[%s5658_s3 + $0x10] sm:$0xff]   ;;  %vm2186_vm2 = vcmask 261120   ;;  %vm2381_vm6 = vcmask 64512  }
   0x2   :  { %v58_v2 = vmul.f32 %v4616_v0, %v4616_v0  ;;  %v4289_v3 = vld [vmem:[%s5658_s3] sm:$0xff]   ;;  %v4292_v6 = vld [vmem:[%s5658_s3 + $0x48] sm:$0xff]   ;;  %v4294_v8 = vld [vmem:[%s5658_s3 + $0x50] sm:$0xff]   ;;  %3821 = vmatprep.mubr.msk.bf16.mxu0 %vm4551_vm0, %v4550_v1  ;;  %3841 = vmatprep.mubr.msk.bf16.mxu1 %vm4551_vm0, %v4550_v1  ;;  %v4691_v23 = vshrl.u32 %v40_v21, 7 }
   0x3   :  { %v4290_v4 = vld [vmem:[%s5658_s3 + $0x40] sm:$0xff]   ;;  %3806 = vmatpush3.bf16.msra.mxu0 %v4289_v3  ;;  %v4295_v9 = vld [vmem:[%s5658_s3 + $0x18] sm:$0xff]   ;;  %v4299_v13 = vld [vmem:[%s5658_s3 + $0x28] sm:$0xff]  }
   0x4   :  { %59 = vadd.xlane.f32.xlu0 %v58_v2  ;;  %3826 = vmatpush3.bf16.msra.mxu1 %v4290_v4  ;;  %v4296_v10 = vld [vmem:[%s5658_s3 + $0x58] sm:$0xff]   ;;  %v4297_v11 = vld [vmem:[%s5658_s3 + $0x20] sm:$0xff]   ;;  %v4300_v14 = vld [vmem:[%s5658_s3 + $0x68] sm:$0xff]   ;;  %v68_v26 = vsub.s32 0, %v4691_v23 }
   0x5   :  { %3807 = vmatprep.subr.bf16.mxu0 %v4550_v1  ;;  %3827 = vmatprep.subr.bf16.mxu1 %v4550_v1  ;;  %v4298_v12 = vld [vmem:[%s5658_s3 + $0x60] sm:$0xff]   ;;  %v4301_v15 = vld [vmem:[%s5658_s3 + $0x30] sm:$0xff]   ;;  %v4303_v17 = vld [vmem:[%s5658_s3 + $0x38] sm:$0xff]  }
   0x6   :  { %v4302_v16 = vld [vmem:[%s5658_s3 + $0x70] sm:$0xff]   ;;  %v4304_v18 = vld [vmem:[%s5658_s3 + $0x78] sm:$0xff]   ;;  %v56_v24 = vld [vmem:[%s5659_s1] sm:$0x1] }
   0x7   :  { %3808 = vmatpush3.bf16.msra.mxu0 %v4291_v5  ;;  %v57_v25 = vunpack.c.l.bf16 %v56_v24  ;;  %v4305_v31 = vld [vmem:[%s5658_s3 + $0x80] sm:$0xff]   ;;  %v4307_v34 = vld [vmem:[%s5658_s3 + $0x88] sm:$0xff]   ;;  %v4309_v36 = vld [vmem:[%s5658_s3 + $0x90] sm:$0xff]  }
   0x8   :  { %3828 = vmatpush3.bf16.msra.mxu1 %v4292_v6  ;;  %3809 = vmatprep.subr.bf16.mxu0 %v4550_v1  ;;  %v4306_v32 = vld [vmem:[%s5658_s3 + $0xc0] sm:$0xff]   ;;  %v4308_v35 = vld [vmem:[%s5658_s3 + $0xc8] sm:$0xff]   ;;  %v4310_v37 = vld [vmem:[%s5658_s3 + $0xd0] sm:$0xff]  }
   0x9   :  { %3829 = vmatprep.subr.bf16.mxu1 %v4550_v1  ;;  %v69_v27 = vrot.slane %v57_v25, %v68_v26  ;;  %v4311_v38 = vld [vmem:[%s5658_s3 + $0x98] sm:$0xff]   ;;  %v4313_v40 = vld [vmem:[%s5658_s3 + $0xa0] sm:$0xff]   ;;  %v4315_v42 = vld [vmem:[%s5658_s3 + $0xa8] sm:$0xff]  }
   0xa   :  { %v4312_v39 = vld [vmem:[%s5658_s3 + $0xd8] sm:$0xff]   ;;  %v4314_v41 = vld [vmem:[%s5658_s3 + $0xe0] sm:$0xff]   ;;  %v4316_v43 = vld [vmem:[%s5658_s3 + $0xe8] sm:$0xff]  }
   0xb   :  { %3810 = vmatpush3.bf16.msra.mxu0 %v4293_v7  ;;  %v4317_v44 = vld [vmem:[%s5658_s3 + $0xb0] sm:$0xff]   ;;  %v4319_v46 = vld [vmem:[%s5658_s3 + $0xb8] sm:$0xff]   ;;  %v4321_v48 = vld [vmem:[%s5658_s3 + $0x100] sm:$0xff]  }
   0xc   :  { %3830 = vmatpush3.bf16.msra.mxu1 %v4294_v8  ;;  %3811 = vmatprep.subr.bf16.mxu0 %v4550_v1  ;;  %v4318_v45 = vld [vmem:[%s5658_s3 + $0xf0] sm:$0xff]   ;;  %v4320_v47 = vld [vmem:[%s5658_s3 + $0xf8] sm:$0xff]   ;;  %v4322_v49 = vld [vmem:[%s5658_s3 + $0x140] sm:$0xff]  }
   0xd   :  { %3831 = vmatprep.subr.bf16.mxu1 %v4550_v1  ;;  %v4323_v50 = vld [vmem:[%s5658_s3 + $0x108] sm:$0xff]   ;;  %v4325_v52 = vld [vmem:[%s5658_s3 + $0x110] sm:$0xff]   ;;  %v4327_v54 = vld [vmem:[%s5658_s3 + $0x118] sm:$0xff]  }
   0xe   :  { %v4324_v51 = vld [vmem:[%s5658_s3 + $0x148] sm:$0xff]   ;;  %v4326_v53 = vld [vmem:[%s5658_s3 + $0x150] sm:$0xff]   ;;  %v4328_v55 = vld [vmem:[%s5658_s3 + $0x158] sm:$0xff]  }
   0xf   :  { %3812 = vmatpush3.bf16.msra.mxu0 %v4295_v9  ;;  %v4329_v56 = vld [vmem:[%s5658_s3 + $0x120] sm:$0xff]   ;;  %v4331_v58 = vld [vmem:[%s5658_s3 + $0x128] sm:$0xff]   ;;  %v4333_v60 = vld [vmem:[%s5658_s3 + $0x130] sm:$0xff]  }
  0x10   :  { %3832 = vmatpush3.bf16.msra.mxu1 %v4296_v10  ;;  %3813 = vmatprep.subr.bf16.mxu0 %v4550_v1  ;;  %v4330_v57 = vld [vmem:[%s5658_s3 + $0x160] sm:$0xff]   ;;  %v4332_v59 = vld [vmem:[%s5658_s3 + $0x168] sm:$0xff]   ;;  %v4334_v61 = vld [vmem:[%s5658_s3 + $0x170] sm:$0xff]  }
  0x11   :  { %3833 = vmatprep.subr.bf16.mxu1 %v4550_v1  ;;  %v4335_v62 = vld [vmem:[%s5658_s3 + $0x138] sm:$0xff]   ;;  %v4338_v2 = vld [vmem:[%s5658_s3 + $0x1c0] sm:$0xff]   ;;  %v4339_v3 = vld [vmem:[%s5658_s3 + $0x188] sm:$0xff]  }
  0x12   :  { %v4336_v63 = vld [vmem:[%s5658_s3 + $0x178] sm:$0xff]   ;;  %v4340_v4 = vld [vmem:[%s5658_s3 + $0x1c8] sm:$0xff]   ;;  %v4341_v5 = vld [vmem:[%s5658_s3 + $0x190] sm:$0xff]  }
  0x13   :  { %3814 = vmatpush3.bf16.msra.mxu0 %v4297_v11  ;;  %v4342_v6 = vld [vmem:[%s5658_s3 + $0x1d0] sm:$0xff]   ;;  %v4343_v7 = vld [vmem:[%s5658_s3 + $0x198] sm:$0xff]   ;;  %v4345_v9 = vld [vmem:[%s5658_s3 + $0x1a0] sm:$0xff]  }
  0x14   :  { %3834 = vmatpush3.bf16.msra.mxu1 %v4298_v12  ;;  %3815 = vmatprep.subr.bf16.mxu0 %v4550_v1  ;;  %v4344_v8 = vld [vmem:[%s5658_s3 + $0x1d8] sm:$0xff]   ;;  %v4346_v10 = vld [vmem:[%s5658_s3 + $0x1e0] sm:$0xff]   ;;  %v4347_v11 = vld [vmem:[%s5658_s3 + $0x1a8] sm:$0xff]  }
  0x15   :  { %3835 = vmatprep.subr.bf16.mxu1 %v4550_v1  ;;  %v4348_v12 = vld [vmem:[%s5658_s3 + $0x1e8] sm:$0xff]   ;;  %v4358_v24 = vld [vmem:[%s5658_s3 + $0x250] sm:$0xff]   ;;  %v4359_v25 = vld [vmem:[%s5658_s3 + $0x218] sm:$0xff]  }
  0x17   :  { %3816 = vmatpush3.bf16.msra.mxu0 %v4299_v13  ;;  %v4349_v13 = vld [vmem:[%s5658_s3 + $0x1b0] sm:$0xff]  }
  0x18   :  { %3836 = vmatpush3.bf16.msra.mxu1 %v4300_v14  ;;  %3817 = vmatprep.subr.bf16.mxu0 %v4550_v1  ;;  %v4350_v14 = vld [vmem:[%s5658_s3 + $0x1f0] sm:$0xff]  }
  0x19   :  { %3837 = vmatprep.subr.bf16.mxu1 %v4550_v1 }
  0x1b   :  { %3818 = vmatpush3.bf16.msra.mxu0 %v4301_v15  ;;  %v4351_v15 = vld [vmem:[%s5658_s3 + $0x1b8] sm:$0xff]  }
  0x1c   :  { %3838 = vmatpush3.bf16.msra.mxu1 %v4302_v16  ;;  %3819 = vmatprep.subr.bf16.mxu0 %v4550_v1  ;;  %v4352_v16 = vld [vmem:[%s5658_s3 + $0x1f8] sm:$0xff]  }
  0x1d   :  { %3839 = vmatprep.subr.bf16.mxu1 %v4550_v1 }
  0x1f   :  { %3820 = vmatpush3.bf16.msra.mxu0 %v4303_v17  ;;  %v4353_v17 = vld [vmem:[%s5658_s3 + $0x200] sm:$0xff]  }
  0x20   :  { %3840 = vmatpush3.bf16.msra.mxu1 %v4304_v18  ;;  %3845 = vmatprep.subr.bf16.mxu0 %v4550_v1  ;;  %v4354_v18 = vld [vmem:[%s5658_s3 + $0x240] sm:$0xff]  }
  0x21   :  { %3865 = vmatprep.subr.bf16.mxu1 %v4550_v1 }
  0x91   :  { %v60_v19 = vpop.xlane.xlu0 %59 }
  0x92   :  { %v62_v20 = vmul.f32 0.0078125, %v60_v19  ;;  %v4355_v19 = vld [vmem:[%s5658_s3 + $0x208] sm:$0xff]  }
  0x94   :  { %v63_v22 = vadd.f32 1e-06, %v62_v20  ;;  %v4356_v20 = vld [vmem:[%s5658_s3 + $0x248] sm:$0xff]  }
  0x96   :  { %4521 = vrsqrt.f32 %v63_v22  ;;  %v4357_v22 = vld [vmem:[%s5658_s3 + $0x210] sm:$0xff]  }
  0xa0   :  { %v4522_v28 = vpop.eup %4521 }
  0xa1   :  { %v65_v29 = vmul.f32 %v4522_v28, %v4616_v0  ;;  %v4337_v0 = vld [vmem:[%s5658_s3 + $0x180] sm:$0xff]  }
  0xa2   :  { %v4361_v28 = vld [vmem:[%s5658_s3 + $0x220] sm:$0xff]  }
  0xa3   :  { %v70_v30 = vmul.f32 %v69_v27, %v65_v29  ;;  %v4360_v27 = vld [vmem:[%s5658_s3 + $0x258] sm:$0xff]   ;;  %v4362_v29 = vld [vmem:[%s5658_s3 + $0x260] sm:$0xff]  }
  0xa5   :  { %v4706_v33 = vpack.c.bf16 %v70_v30, %v70_v30  ;;  %v4363_v30 = vld [vmem:[%s5658_s3 + $0x228] sm:$0xff]  }
  0xa7   :  { %3822 = vmatmul.mubr.bf16.vlgmr.msra.gmra.mrb[0].mxu0 %v4706_v33  ;;  %3842 = vmatmul.mubr.bf16.vlgmr.msra.gmra.mrb[0].mxu1 %v4706_v33 }
  0xa8   :  { %3846 = vmatpush3.bf16.msra.mxu0 %v4305_v31  ;;  %3866 = vmatpush3.bf16.msra.mxu1 %v4306_v32  ;;  %v4364_v31 = vld [vmem:[%s5658_s3 + $0x268] sm:$0xff]   ;;  %v4365_v32 = vld [vmem:[%s5658_s3 + $0x230] sm:$0xff]  }
  0xa9   :  { %3847 = vmatprep.subr.bf16.mxu0 %v4550_v1  ;;  %3867 = vmatprep.subr.bf16.mxu1 %v4550_v1 }
  0xaa   :  { %3861 = vmatprep.mubr.msk.bf16.mxu0 %vm4551_vm0, %v4550_v1  ;;  %3881 = vmatprep.mubr.msk.bf16.mxu1 %vm4551_vm0, %v4550_v1 }
  0xac   :  { %3848 = vmatpush3.bf16.msra.mxu0 %v4307_v34  ;;  %3868 = vmatpush3.bf16.msra.mxu1 %v4308_v35  ;;  %v4366_v34 = vld [vmem:[%s5658_s3 + $0x270] sm:$0xff]   ;;  %v4367_v35 = vld [vmem:[%s5658_s3 + $0x238] sm:$0xff]  }
  0xad   :  { %3849 = vmatprep.subr.bf16.mxu0 %v4550_v1  ;;  %3869 = vmatprep.subr.bf16.mxu1 %v4550_v1 }
  0xb0   :  { %3850 = vmatpush3.bf16.msra.mxu0 %v4309_v36  ;;  %3870 = vmatpush3.bf16.msra.mxu1 %v4310_v37  ;;  %v4368_v36 = vld [vmem:[%s5658_s3 + $0x278] sm:$0xff]   ;;  %v4369_v37 = vld [vmem:[%s5658_s3 + $0x280] sm:$0xff]  }
  0xb1   :  { %3851 = vmatprep.subr.bf16.mxu0 %v4550_v1  ;;  %3871 = vmatprep.subr.bf16.mxu1 %v4550_v1 }
  0xb4   :  { %3852 = vmatpush3.bf16.msra.mxu0 %v4311_v38  ;;  %3872 = vmatpush3.bf16.msra.mxu1 %v4312_v39  ;;  %v4370_v38 = vld [vmem:[%s5658_s3 + $0x2c0] sm:$0xff]   ;;  %v4371_v39 = vld [vmem:[%s5658_s3 + $0x288] sm:$0xff]  }
  0xb5   :  { %3853 = vmatprep.subr.bf16.mxu0 %v4550_v1  ;;  %3873 = vmatprep.subr.bf16.mxu1 %v4550_v1 }
  0xb8   :  { %3854 = vmatpush3.bf16.msra.mxu0 %v4313_v40  ;;  %3874 = vmatpush3.bf16.msra.mxu1 %v4314_v41  ;;  %v4372_v40 = vld [vmem:[%s5658_s3 + $0x2c8] sm:$0xff]   ;;  %v4373_v41 = vld [vmem:[%s5658_s3 + $0x290] sm:$0xff]  }
  0xb9   :  { %3855 = vmatprep.subr.bf16.mxu0 %v4550_v1  ;;  %3875 = vmatprep.subr.bf16.mxu1 %v4550_v1 }
  0xbc   :  { %3856 = vmatpush3.bf16.msra.mxu0 %v4315_v42  ;;  %3876 = vmatpush3.bf16.msra.mxu1 %v4316_v43  ;;  %v4374_v42 = vld [vmem:[%s5658_s3 + $0x2d0] sm:$0xff]   ;;  %v4375_v43 = vld [vmem:[%s5658_s3 + $0x298] sm:$0xff]  }
  0xbd   :  { %3857 = vmatprep.subr.bf16.mxu0 %v4550_v1  ;;  %3877 = vmatprep.subr.bf16.mxu1 %v4550_v1 }
  0xc0   :  { %3858 = vmatpush3.bf16.msra.mxu0 %v4317_v44  ;;  %3878 = vmatpush3.bf16.msra.mxu1 %v4318_v45  ;;  %v4376_v44 = vld [vmem:[%s5658_s3 + $0x2d8] sm:$0xff]   ;;  %v4377_v45 = vld [vmem:[%s5658_s3 + $0x2a0] sm:$0xff]  }
  0xc1   :  { %3859 = vmatprep.subr.bf16.mxu0 %v4550_v1  ;;  %3879 = vmatprep.subr.bf16.mxu1 %v4550_v1 }
  0xc4   :  { %3860 = vmatpush3.bf16.msra.mxu0 %v4319_v46  ;;  %3880 = vmatpush3.bf16.msra.mxu1 %v4320_v47  ;;  %v4378_v46 = vld [vmem:[%s5658_s3 + $0x2e0] sm:$0xff]   ;;  %v4379_v47 = vld [vmem:[%s5658_s3 + $0x2a8] sm:$0xff]  }
  0xc5   :  { %3885 = vmatprep.subr.bf16.mxu0 %v4550_v1  ;;  %3905 = vmatprep.subr.bf16.mxu1 %v4550_v1 }
  0xc7   :  { %3862 = vmatmul.mubr.bf16.vlgmr.msra.gmra.mrb[4].mxu0 %v4706_v33  ;;  %3882 = vmatmul.mubr.bf16.vlgmr.msra.gmra.mrb[4].mxu1 %v4706_v33 }
  0xc8   :  { %3886 = vmatpush3.bf16.msra.mxu0 %v4321_v48  ;;  %3906 = vmatpush3.bf16.msra.mxu1 %v4322_v49  ;;  %v4380_v48 = vld [vmem:[%s5658_s3 + $0x2e8] sm:$0xff]   ;;  %v4381_v49 = vld [vmem:[%s5658_s3 + $0x2b0] sm:$0xff]  }
  0xc9   :  { %3887 = vmatprep.subr.bf16.mxu0 %v4550_v1  ;;  %3907 = vmatprep.subr.bf16.mxu1 %v4550_v1 }
  0xca   :  { %3901 = vmatprep.mubr.msk.bf16.mxu0 %vm4551_vm0, %v4550_v1  ;;  %3921 = vmatprep.mubr.msk.bf16.mxu1 %vm4551_vm0, %v4550_v1 }
  0xcc   :  { %3888 = vmatpush3.bf16.msra.mxu0 %v4323_v50  ;;  %3908 = vmatpush3.bf16.msra.mxu1 %v4324_v51  ;;  %v4382_v50 = vld [vmem:[%s5658_s3 + $0x2f0] sm:$0xff]   ;;  %v4383_v51 = vld [vmem:[%s5658_s3 + $0x2b8] sm:$0xff]  }
  0xcd   :  { %3889 = vmatprep.subr.bf16.mxu0 %v4550_v1  ;;  %3909 = vmatprep.subr.bf16.mxu1 %v4550_v1 }
  0xd0   :  { %3890 = vmatpush3.bf16.msra.mxu0 %v4325_v52  ;;  %3910 = vmatpush3.bf16.msra.mxu1 %v4326_v53  ;;  %v4384_v52 = vld [vmem:[%s5658_s3 + $0x2f8] sm:$0xff]   ;;  %v4385_v53 = vld [vmem:[%s5658_s3 + $0x300] sm:$0xff]  }
  0xd1   :  { %3891 = vmatprep.subr.bf16.mxu0 %v4550_v1  ;;  %3911 = vmatprep.subr.bf16.mxu1 %v4550_v1 }
  0xd4   :  { %3892 = vmatpush3.bf16.msra.mxu0 %v4327_v54  ;;  %3912 = vmatpush3.bf16.msra.mxu1 %v4328_v55  ;;  %v4386_v54 = vld [vmem:[%s5658_s3 + $0x340] sm:$0xff]   ;;  %v4387_v55 = vld [vmem:[%s5658_s3 + $0x308] sm:$0xff]  }
  0xd5   :  { %3893 = vmatprep.subr.bf16.mxu0 %v4550_v1  ;;  %3913 = vmatprep.subr.bf16.mxu1 %v4550_v1 }
  0xd8   :  { %3894 = vmatpush3.bf16.msra.mxu0 %v4329_v56  ;;  %3914 = vmatpush3.bf16.msra.mxu1 %v4330_v57  ;;  %v4388_v56 = vld [vmem:[%s5658_s3 + $0x348] sm:$0xff]   ;;  %v4389_v57 = vld [vmem:[%s5658_s3 + $0x310] sm:$0xff]  }
  0xd9   :  { %3895 = vmatprep.subr.bf16.mxu0 %v4550_v1  ;;  %3915 = vmatprep.subr.bf16.mxu1 %v4550_v1 }
  0xdc   :  { %3896 = vmatpush3.bf16.msra.mxu0 %v4331_v58  ;;  %3916 = vmatpush3.bf16.msra.mxu1 %v4332_v59  ;;  %v4390_v58 = vld [vmem:[%s5658_s3 + $0x350] sm:$0xff]   ;;  %v4391_v59 = vld [vmem:[%s5658_s3 + $0x318] sm:$0xff]  }
  0xdd   :  { %3897 = vmatprep.subr.bf16.mxu0 %v4550_v1  ;;  %3917 = vmatprep.subr.bf16.mxu1 %v4550_v1 }
  0xe0   :  { %3898 = vmatpush3.bf16.msra.mxu0 %v4333_v60  ;;  %3918 = vmatpush3.bf16.msra.mxu1 %v4334_v61  ;;  %v4392_v60 = vld [vmem:[%s5658_s3 + $0x358] sm:$0xff]   ;;  %v4393_v61 = vld [vmem:[%s5658_s3 + $0x320] sm:$0xff]  }
  0xe1   :  { %3899 = vmatprep.subr.bf16.mxu0 %v4550_v1  ;;  %3919 = vmatprep.subr.bf16.mxu1 %v4550_v1 }
  0xe4   :  { %3900 = vmatpush3.bf16.msra.mxu0 %v4335_v62  ;;  %3920 = vmatpush3.bf16.msra.mxu1 %v4336_v63  ;;  %v4394_v62 = vld [vmem:[%s5658_s3 + $0x360] sm:$0xff]   ;;  %v4395_v63 = vld [vmem:[%s5658_s3 + $0x328] sm:$0xff]  }
  0xe5   :  { %3925 = vmatprep.subr.bf16.mxu0 %v4550_v1  ;;  %3945 = vmatprep.subr.bf16.mxu1 %v4550_v1 }
  0xe7   :  { %3902 = vmatmul.mubr.bf16.vlgmr.msra.gmra.mrb[8].mxu0 %v4706_v33  ;;  %3922 = vmatmul.mubr.bf16.vlgmr.msra.gmra.mrb[8].mxu1 %v4706_v33 }
  0xe8   :  { %3926 = vmatpush3.bf16.msra.mxu0 %v4337_v0  ;;  %3946 = vmatpush3.bf16.msra.mxu1 %v4338_v2  ;;  %v4396_v0 = vld [vmem:[%s5658_s3 + $0x368] sm:$0xff]   ;;  %v4397_v2 = vld [vmem:[%s5658_s3 + $0x330] sm:$0xff]  }
  0xe9   :  { %3927 = vmatprep.subr.bf16.mxu0 %v4550_v1  ;;  %3947 = vmatprep.subr.bf16.mxu1 %v4550_v1 }
  0xea   :  { %3941 = vmatprep.mubr.msk.bf16.mxu0 %vm4551_vm0, %v4550_v1  ;;  %3961 = vmatprep.mubr.msk.bf16.mxu1 %vm4551_vm0, %v4550_v1 }
  0xec   :  { %3928 = vmatpush3.bf16.msra.mxu0 %v4339_v3  ;;  %3948 = vmatpush3.bf16.msra.mxu1 %v4340_v4  ;;  %v4398_v3 = vld [vmem:[%s5658_s3 + $0x370] sm:$0xff]   ;;  %v4399_v4 = vld [vmem:[%s5658_s3 + $0x338] sm:$0xff]  }
  0xed   :  { %3929 = vmatprep.subr.bf16.mxu0 %v4550_v1  ;;  %3949 = vmatprep.subr.bf16.mxu1 %v4550_v1 }
  0xf0   :  { %3930 = vmatpush3.bf16.msra.mxu0 %v4341_v5  ;;  %3950 = vmatpush3.bf16.msra.mxu1 %v4342_v6  ;;  %v4400_v5 = vld [vmem:[%s5658_s3 + $0x378] sm:$0xff]   ;;  %v4401_v6 = vld [vmem:[%s5658_s3 + $0x380] sm:$0xff]  }
  0xf1   :  { %3931 = vmatprep.subr.bf16.mxu0 %v4550_v1  ;;  %3951 = vmatprep.subr.bf16.mxu1 %v4550_v1 }
  0xf4   :  { %3932 = vmatpush3.bf16.msra.mxu0 %v4343_v7  ;;  %3952 = vmatpush3.bf16.msra.mxu1 %v4344_v8  ;;  %v4402_v7 = vld [vmem:[%s5658_s3 + $0x3c0] sm:$0xff]   ;;  %v4403_v8 = vld [vmem:[%s5658_s3 + $0x388] sm:$0xff]  }
  0xf5   :  { %3933 = vmatprep.subr.bf16.mxu0 %v4550_v1  ;;  %3953 = vmatprep.subr.bf16.mxu1 %v4550_v1 }
  0xf8   :  { %3934 = vmatpush3.bf16.msra.mxu0 %v4345_v9  ;;  %3954 = vmatpush3.bf16.msra.mxu1 %v4346_v10  ;;  %v4404_v9 = vld [vmem:[%s5658_s3 + $0x3c8] sm:$0xff]   ;;  %v4405_v10 = vld [vmem:[%s5658_s3 + $0x390] sm:$0xff]  }
  0xf9   :  { %3935 = vmatprep.subr.bf16.mxu0 %v4550_v1  ;;  %3955 = vmatprep.subr.bf16.mxu1 %v4550_v1 }
  0xfc   :  { %3936 = vmatpush3.bf16.msra.mxu0 %v4347_v11  ;;  %3956 = vmatpush3.bf16.msra.mxu1 %v4348_v12  ;;  %v4406_v11 = vld [vmem:[%s5658_s3 + $0x3d0] sm:$0xff]   ;;  %v4407_v12 = vld [vmem:[%s5658_s3 + $0x398] sm:$0xff]  }
  0xfd   :  { %3937 = vmatprep.subr.bf16.mxu0 %v4550_v1  ;;  %3957 = vmatprep.subr.bf16.mxu1 %v4550_v1 }
 0x100   :  { %3938 = vmatpush3.bf16.msra.mxu0 %v4349_v13  ;;  %3958 = vmatpush3.bf16.msra.mxu1 %v4350_v14  ;;  %v4408_v13 = vld [vmem:[%s5658_s3 + $0x3d8] sm:$0xff]   ;;  %v4409_v14 = vld [vmem:[%s5658_s3 + $0x3a0] sm:$0xff]  }
 0x101   :  { %3939 = vmatprep.subr.bf16.mxu0 %v4550_v1  ;;  %3959 = vmatprep.subr.bf16.mxu1 %v4550_v1 }
 0x104   :  { %3940 = vmatpush3.bf16.msra.mxu0 %v4351_v15  ;;  %3960 = vmatpush3.bf16.msra.mxu1 %v4352_v16  ;;  %v4410_v15 = vld [vmem:[%s5658_s3 + $0x3e0] sm:$0xff]   ;;  %v4411_v16 = vld [vmem:[%s5658_s3 + $0x3a8] sm:$0xff]  }
 0x105   :  { %3965 = vmatprep.subr.bf16.mxu0 %v4550_v1  ;;  %3985 = vmatprep.subr.bf16.mxu1 %v4550_v1 }
 0x107   :  { %3942 = vmatmul.mubr.bf16.vlgmr.msra.gmra.mrb[12].mxu0 %v4706_v33  ;;  %3962 = vmatmul.mubr.bf16.vlgmr.msra.gmra.mrb[12].mxu1 %v4706_v33 }
 0x108   :  { %3966 = vmatpush3.bf16.msra.mxu0 %v4353_v17  ;;  %3986 = vmatpush3.bf16.msra.mxu1 %v4354_v18  ;;  %v4412_v17 = vld [vmem:[%s5658_s3 + $0x3e8] sm:$0xff]  }
 0x109   :  { %3967 = vmatprep.subr.bf16.mxu0 %v4550_v1  ;;  %3987 = vmatprep.subr.bf16.mxu1 %v4550_v1 }
 0x10a   :  { %3981 = vmatprep.mubr.msk.bf16.mxu0 %vm4551_vm0, %v4550_v1  ;;  %4001 = vmatprep.mubr.msk.bf16.mxu1 %vm4551_vm0, %v4550_v1 }
 0x10c   :  { %3968 = vmatpush3.bf16.msra.mxu0 %v4355_v19  ;;  %3988 = vmatpush3.bf16.msra.mxu1 %v4356_v20 }
 0x10d   :  { %3969 = vmatprep.subr.bf16.mxu0 %v4550_v1  ;;  %3989 = vmatprep.subr.bf16.mxu1 %v4550_v1 }
 0x110   :  { %3970 = vmatpush3.bf16.msra.mxu0 %v4357_v22  ;;  %3990 = vmatpush3.bf16.msra.mxu1 %v4358_v24 }
 0x111   :  { %3971 = vmatprep.subr.bf16.mxu0 %v4550_v1  ;;  %3991 = vmatprep.subr.bf16.mxu1 %v4550_v1 }
 0x114   :  { %3972 = vmatpush3.bf16.msra.mxu0 %v4359_v25  ;;  %3992 = vmatpush3.bf16.msra.mxu1 %v4360_v27  ;;  %v4413_v27 = vld [vmem:[%s5658_s3 + $0x3b0] sm:$0xff]  }
 0x115   :  { %3973 = vmatprep.subr.bf16.mxu0 %v4550_v1  ;;  %3993 = vmatprep.subr.bf16.mxu1 %v4550_v1 }
 0x118   :  { %3974 = vmatpush3.bf16.msra.mxu0 %v4361_v28  ;;  %3994 = vmatpush3.bf16.msra.mxu1 %v4362_v29  ;;  %v4414_v28 = vld [vmem:[%s5658_s3 + $0x3f0] sm:$0xff]  }
 0x119   :  { %3975 = vmatprep.subr.bf16.mxu0 %v4550_v1  ;;  %3995 = vmatprep.subr.bf16.mxu1 %v4550_v1 }
 0x11c   :  { %3976 = vmatpush3.bf16.msra.mxu0 %v4363_v30  ;;  %3996 = vmatpush3.bf16.msra.mxu1 %v4364_v31  ;;  %v4415_v31 = vld [vmem:[%s5658_s3 + $0x3b8] sm:$0xff]  }
 0x11d   :  { %3977 = vmatprep.subr.bf16.mxu0 %v4550_v1  ;;  %3997 = vmatprep.subr.bf16.mxu1 %v4550_v1 }
 0x120   :  { %3978 = vmatpush3.bf16.msra.mxu0 %v4365_v32  ;;  %3998 = vmatpush3.bf16.msra.mxu1 %v4366_v34  ;;  %v4416_v32 = vld [vmem:[%s5658_s3 + $0x3f8] sm:$0xff]   ;;  %v4417_v34 = vld [vmem:[%s5658_s3 + $0x400] sm:$0xff]  }
 0x121   :  { %3979 = vmatprep.subr.bf16.mxu0 %v4550_v1  ;;  %3999 = vmatprep.subr.bf16.mxu1 %v4550_v1 }
 0x124   :  { %3980 = vmatpush3.bf16.msra.mxu0 %v4367_v35  ;;  %4000 = vmatpush3.bf16.msra.mxu1 %v4368_v36  ;;  %v4418_v35 = vld [vmem:[%s5658_s3 + $0x440] sm:$0xff]   ;;  %v4419_v36 = vld [vmem:[%s5658_s3 + $0x408] sm:$0xff]  }
 0x125   :  { %4005 = vmatprep.subr.bf16.mxu0 %v4550_v1  ;;  %4025 = vmatprep.subr.bf16.mxu1 %v4550_v1 }
 0x127   :  { %3982 = vmatmul.mubr.bf16.vlgmr.msra.gmra.mrb[16].mxu0 %v4706_v33  ;;  %4002 = vmatmul.mubr.bf16.vlgmr.msra.gmra.mrb[16].mxu1 %v4706_v33 }
 0x128   :  { %4006 = vmatpush3.bf16.msra.mxu0 %v4369_v37  ;;  %4026 = vmatpush3.bf16.msra.mxu1 %v4370_v38  ;;  %v4420_v37 = vld [vmem:[%s5658_s3 + $0x448] sm:$0xff]   ;;  %v4421_v38 = vld [vmem:[%s5658_s3 + $0x410] sm:$0xff]  }
 0x129   :  { %4007 = vmatprep.subr.bf16.mxu0 %v4550_v1  ;;  %4027 = vmatprep.subr.bf16.mxu1 %v4550_v1 }
 0x12a   :  { %4021 = vmatprep.mubr.msk.bf16.mxu0 %vm4551_vm0, %v4550_v1  ;;  %4041 = vmatprep.mubr.msk.bf16.mxu1 %vm4551_vm0, %v4550_v1 }
 0x12c   :  { %4008 = vmatpush3.bf16.msra.mxu0 %v4371_v39  ;;  %4028 = vmatpush3.bf16.msra.mxu1 %v4372_v40  ;;  %v4422_v39 = vld [vmem:[%s5658_s3 + $0x450] sm:$0xff]   ;;  %v4423_v40 = vld [vmem:[%s5658_s3 + $0x418] sm:$0xff]  }
 0x12d   :  { %4009 = vmatprep.subr.bf16.mxu0 %v4550_v1  ;;  %4029 = vmatprep.subr.bf16.mxu1 %v4550_v1 }
 0x130   :  { %4010 = vmatpush3.bf16.msra.mxu0 %v4373_v41  ;;  %4030 = vmatpush3.bf16.msra.mxu1 %v4374_v42  ;;  %v4424_v41 = vld [vmem:[%s5658_s3 + $0x458] sm:$0xff]   ;;  %v4425_v42 = vld [vmem:[%s5658_s3 + $0x420] sm:$0xff]  }
 0x131   :  { %4011 = vmatprep.subr.bf16.mxu0 %v4550_v1  ;;  %4031 = vmatprep.subr.bf16.mxu1 %v4550_v1 }
 0x134   :  { %4012 = vmatpush3.bf16.msra.mxu0 %v4375_v43  ;;  %4032 = vmatpush3.bf16.msra.mxu1 %v4376_v44  ;;  %v4426_v43 = vld [vmem:[%s5658_s3 + $0x460] sm:$0xff]   ;;  %v4427_v44 = vld [vmem:[%s5658_s3 + $0x428] sm:$0xff]  }
 0x135   :  { %4013 = vmatprep.subr.bf16.mxu0 %v4550_v1  ;;  %4033 = vmatprep.subr.bf16.mxu1 %v4550_v1 }
 0x138   :  { %4014 = vmatpush3.bf16.msra.mxu0 %v4377_v45  ;;  %4034 = vmatpush3.bf16.msra.mxu1 %v4378_v46  ;;  %v4428_v45 = vld [vmem:[%s5658_s3 + $0x468] sm:$0xff]  }
 0x139   :  { %4015 = vmatprep.subr.bf16.mxu0 %v4550_v1  ;;  %4035 = vmatprep.subr.bf16.mxu1 %v4550_v1 }
 0x13c   :  { %4016 = vmatpush3.bf16.msra.mxu0 %v4379_v47  ;;  %4036 = vmatpush3.bf16.msra.mxu1 %v4380_v48 }
 0x13d   :  { %4017 = vmatprep.subr.bf16.mxu0 %v4550_v1  ;;  %4037 = vmatprep.subr.bf16.mxu1 %v4550_v1 }
 0x140   :  { %4018 = vmatpush3.bf16.msra.mxu0 %v4381_v49  ;;  %4038 = vmatpush3.bf16.msra.mxu1 %v4382_v50 }
 0x141   :  { %4019 = vmatprep.subr.bf16.mxu0 %v4550_v1  ;;  %4039 = vmatprep.subr.bf16.mxu1 %v4550_v1 }
 0x144   :  { %4020 = vmatpush3.bf16.msra.mxu0 %v4383_v51  ;;  %4040 = vmatpush3.bf16.msra.mxu1 %v4384_v52  ;;  %v4429_v52 = vld [vmem:[%s5658_s3 + $0x430] sm:$0xff]  }
 0x145   :  { %4045 = vmatprep.subr.bf16.mxu0 %v4550_v1  ;;  %4065 = vmatprep.subr.bf16.mxu1 %v4550_v1 }
 0x147   :  { %4022 = vmatmul.mubr.bf16.vlgmr.msra.gmra.mrb[20].mxu0 %v4706_v33  ;;  %4042 = vmatmul.mubr.bf16.vlgmr.msra.gmra.mrb[20].mxu1 %v4706_v33 }
 0x148   :  { %4046 = vmatpush3.bf16.msra.mxu0 %v4385_v53  ;;  %4066 = vmatpush3.bf16.msra.mxu1 %v4386_v54  ;;  %v4430_v53 = vld [vmem:[%s5658_s3 + $0x470] sm:$0xff]  }
 0x149   :  { %4047 = vmatprep.subr.bf16.mxu0 %v4550_v1  ;;  %4067 = vmatprep.subr.bf16.mxu1 %v4550_v1 }
 0x14a   :  { %4061 = vmatprep.mubr.msk.bf16.mxu0 %vm4551_vm0, %v4550_v1  ;;  %4081 = vmatprep.mubr.msk.bf16.mxu1 %vm4551_vm0, %v4550_v1 }
 0x14c   :  { %4048 = vmatpush3.bf16.msra.mxu0 %v4387_v55  ;;  %4068 = vmatpush3.bf16.msra.mxu1 %v4388_v56  ;;  %v4431_v56 = vld [vmem:[%s5658_s3 + $0x438] sm:$0xff]  }
 0x14d   :  { %4049 = vmatprep.subr.bf16.mxu0 %v4550_v1  ;;  %4069 = vmatprep.subr.bf16.mxu1 %v4550_v1 }
 0x150   :  { %4050 = vmatpush3.bf16.msra.mxu0 %v4389_v57  ;;  %4070 = vmatpush3.bf16.msra.mxu1 %v4390_v58  ;;  %v4432_v57 = vld [vmem:[%s5658_s3 + $0x478] sm:$0xff]   ;;  %v4433_v58 = vld [vmem:[%s5658_s3 + $0x480] sm:$0xff]  }
 0x151   :  { %4051 = vmatprep.subr.bf16.mxu0 %v4550_v1  ;;  %4071 = vmatprep.subr.bf16.mxu1 %v4550_v1 }
 0x154   :  { %4052 = vmatpush3.bf16.msra.mxu0 %v4391_v59  ;;  %4072 = vmatpush3.bf16.msra.mxu1 %v4392_v60  ;;  %v4434_v59 = vld [vmem:[%s5658_s3 + $0x4c0] sm:$0xff]   ;;  %v4435_v60 = vld [vmem:[%s5658_s3 + $0x488] sm:$0xff]  }
 0x155   :  { %4053 = vmatprep.subr.bf16.mxu0 %v4550_v1  ;;  %4073 = vmatprep.subr.bf16.mxu1 %v4550_v1 }
 0x158   :  { %4054 = vmatpush3.bf16.msra.mxu0 %v4393_v61  ;;  %4074 = vmatpush3.bf16.msra.mxu1 %v4394_v62  ;;  %v4436_v61 = vld [vmem:[%s5658_s3 + $0x4c8] sm:$0xff]   ;;  %v4437_v62 = vld [vmem:[%s5658_s3 + $0x490] sm:$0xff]  }
 0x159   :  { %4055 = vmatprep.subr.bf16.mxu0 %v4550_v1  ;;  %4075 = vmatprep.subr.bf16.mxu1 %v4550_v1 }
 0x15c   :  { %4056 = vmatpush3.bf16.msra.mxu0 %v4395_v63  ;;  %4076 = vmatpush3.bf16.msra.mxu1 %v4396_v0  ;;  %v4438_v63 = vld [vmem:[%s5658_s3 + $0x4d0] sm:$0xff]   ;;  %v4439_v0 = vld [vmem:[%s5658_s3 + $0x498] sm:$0xff]  }
 0x15d   :  { %4057 = vmatprep.subr.bf16.mxu0 %v4550_v1  ;;  %4077 = vmatprep.subr.bf16.mxu1 %v4550_v1 }
 0x160   :  { %4058 = vmatpush3.bf16.msra.mxu0 %v4397_v2  ;;  %4078 = vmatpush3.bf16.msra.mxu1 %v4398_v3  ;;  %v4440_v2 = vld [vmem:[%s5658_s3 + $0x4d8] sm:$0xff]   ;;  %v4441_v3 = vld [vmem:[%s5658_s3 + $0x4a0] sm:$0xff]  }
 0x161   :  { %4059 = vmatprep.subr.bf16.mxu0 %v4550_v1  ;;  %4079 = vmatprep.subr.bf16.mxu1 %v4550_v1 }
 0x164   :  { %4060 = vmatpush3.bf16.msra.mxu0 %v4399_v4  ;;  %4080 = vmatpush3.bf16.msra.mxu1 %v4400_v5  ;;  %v4442_v4 = vld [vmem:[%s5658_s3 + $0x4e0] sm:$0xff]   ;;  %v4443_v5 = vld [vmem:[%s5658_s3 + $0x4a8] sm:$0xff]  }
 0x165   :  { %4085 = vmatprep.subr.bf16.mxu0 %v4550_v1  ;;  %4105 = vmatprep.subr.bf16.mxu1 %v4550_v1 }
 0x167   :  { %4062 = vmatmul.mubr.bf16.vlgmr.msra.gmra.mrb[24].mxu0 %v4706_v33  ;;  %4082 = vmatmul.mubr.bf16.vlgmr.msra.gmra.mrb[24].mxu1 %v4706_v33 }
 0x168   :  { %4086 = vmatpush3.bf16.msra.mxu0 %v4401_v6  ;;  %4106 = vmatpush3.bf16.msra.mxu1 %v4402_v7  ;;  %v4444_v6 = vld [vmem:[%s5658_s3 + $0x4e8] sm:$0xff]  }
 0x169   :  { %4087 = vmatprep.subr.bf16.mxu0 %v4550_v1  ;;  %4107 = vmatprep.subr.bf16.mxu1 %v4550_v1 }
 0x16a   :  { %4101 = vmatprep.mubr.msk.bf16.mxu0 %vm4551_vm0, %v4550_v1  ;;  %4121 = vmatprep.mubr.msk.bf16.mxu1 %vm4551_vm0, %v4550_v1 }
 0x16c   :  { %4088 = vmatpush3.bf16.msra.mxu0 %v4403_v8  ;;  %4108 = vmatpush3.bf16.msra.mxu1 %v4404_v9 }
 0x16d   :  { %4089 = vmatprep.subr.bf16.mxu0 %v4550_v1  ;;  %4109 = vmatprep.subr.bf16.mxu1 %v4550_v1 }
 0x170   :  { %4090 = vmatpush3.bf16.msra.mxu0 %v4405_v10  ;;  %4110 = vmatpush3.bf16.msra.mxu1 %v4406_v11 }
 0x171   :  { %4091 = vmatprep.subr.bf16.mxu0 %v4550_v1  ;;  %4111 = vmatprep.subr.bf16.mxu1 %v4550_v1 }
 0x174   :  { %4092 = vmatpush3.bf16.msra.mxu0 %v4407_v12  ;;  %4112 = vmatpush3.bf16.msra.mxu1 %v4408_v13  ;;  %v4445_v13 = vld [vmem:[%s5658_s3 + $0x4b0] sm:$0xff]  }
 0x175   :  { %4093 = vmatprep.subr.bf16.mxu0 %v4550_v1  ;;  %4113 = vmatprep.subr.bf16.mxu1 %v4550_v1 }
 0x178   :  { %4094 = vmatpush3.bf16.msra.mxu0 %v4409_v14  ;;  %4114 = vmatpush3.bf16.msra.mxu1 %v4410_v15  ;;  %v4446_v14 = vld [vmem:[%s5658_s3 + $0x4f0] sm:$0xff]  }
 0x179   :  { %4095 = vmatprep.subr.bf16.mxu0 %v4550_v1  ;;  %4115 = vmatprep.subr.bf16.mxu1 %v4550_v1 }
 0x17a   :  { %v5174_v18 = vpop.f32.mrb[0].mxu0  ;;  %v5176_v19 = vpop.f32.mrb[0].mxu1 }
 0x17b   :  { %v3823_v20 = vpop.f32.mrb[1].mxu0  ;;  %v3843_v22 = vpop.f32.mrb[1].mxu1 }
 0x17c   :  { %4096 = vmatpush3.bf16.msra.mxu0 %v4411_v16  ;;  %4116 = vmatpush3.bf16.msra.mxu1 %v4412_v17  ;;  %v477_v24 = vpop.f32.mrb[2].mxu0  ;;  %v565_v25 = vpop.f32.mrb[2].mxu1  ;;  %v4447_v17 = vld [vmem:[%s5658_s3 + $0x4b8] sm:$0xff]  }
 0x17d   :  { %v3824_v29 = vpop.f32.mrb[3].mxu0  ;;  %v3844_v30 = vpop.f32.mrb[3].mxu1  ;;  %4097 = vmatprep.subr.bf16.mxu0 %v4550_v1  ;;  %4117 = vmatprep.subr.bf16.mxu1 %v4550_v1  ;;  %v4448_v20 = vld [vmem:[%s5658_s3 + $0x4f8] sm:$0xff]  }
 0x180   :  { %4098 = vmatpush3.bf16.msra.mxu0 %v4413_v27  ;;  %4118 = vmatpush3.bf16.msra.mxu1 %v4414_v28 }
 0x181   :  { %4099 = vmatprep.subr.bf16.mxu0 %v4550_v1  ;;  %4119 = vmatprep.subr.bf16.mxu1 %v4550_v1 }
 0x184   :  { %4100 = vmatpush3.bf16.msra.mxu0 %v4415_v31  ;;  %4120 = vmatpush3.bf16.msra.mxu1 %v4416_v32 }
 0x185   :  { %4125 = vmatprep.subr.bf16.mxu0 %v4550_v1  ;;  %4145 = vmatprep.subr.bf16.mxu1 %v4550_v1 }
 0x187   :  { %4102 = vmatmul.mubr.bf16.vlgmr.msra.gmra.mrb[28].mxu0 %v4706_v33  ;;  %4122 = vmatmul.mubr.bf16.vlgmr.msra.gmra.mrb[28].mxu1 %v4706_v33 }
 0x188   :  { %4126 = vmatpush3.bf16.msra.mxu0 %v4417_v34  ;;  %4146 = vmatpush3.bf16.msra.mxu1 %v4418_v35 }
 0x189   :  { %4127 = vmatprep.subr.bf16.mxu0 %v4550_v1  ;;  %4147 = vmatprep.subr.bf16.mxu1 %v4550_v1 }
 0x18a   :  { %4141 = vmatprep.mubr.msk.bf16.mxu0 %vm4551_vm0, %v4550_v1  ;;  %4161 = vmatprep.mubr.msk.bf16.mxu1 %vm4551_vm0, %v4550_v1 }
 0x18c   :  { %4128 = vmatpush3.bf16.msra.mxu0 %v4419_v36  ;;  %4148 = vmatpush3.bf16.msra.mxu1 %v4420_v37 }
 0x18d   :  { %4129 = vmatprep.subr.bf16.mxu0 %v4550_v1  ;;  %4149 = vmatprep.subr.bf16.mxu1 %v4550_v1 }
 0x190   :  { %4130 = vmatpush3.bf16.msra.mxu0 %v4421_v38  ;;  %4150 = vmatpush3.bf16.msra.mxu1 %v4422_v39 }
 0x191   :  { %4131 = vmatprep.subr.bf16.mxu0 %v4550_v1  ;;  %4151 = vmatprep.subr.bf16.mxu1 %v4550_v1 }
 0x194   :  { %4132 = vmatpush3.bf16.msra.mxu0 %v4423_v40  ;;  %4152 = vmatpush3.bf16.msra.mxu1 %v4424_v41 }
 0x195   :  { %4133 = vmatprep.subr.bf16.mxu0 %v4550_v1  ;;  %4153 = vmatprep.subr.bf16.mxu1 %v4550_v1 }
 0x198   :  { %4134 = vmatpush3.bf16.msra.mxu0 %v4425_v42  ;;  %4154 = vmatpush3.bf16.msra.mxu1 %v4426_v43 }
 0x199   :  { %4135 = vmatprep.subr.bf16.mxu0 %v4550_v1  ;;  %4155 = vmatprep.subr.bf16.mxu1 %v4550_v1 }
 0x19a   :  { %v5248_v46 = vpop.f32.mrb[4].mxu0  ;;  %v5250_v47 = vpop.f32.mrb[4].mxu1 }
 0x19b   :  { %v3863_v48 = vpop.f32.mrb[5].mxu0  ;;  %v3883_v49 = vpop.f32.mrb[5].mxu1 }
 0x19c   :  { %v653_v50 = vpop.f32.mrb[6].mxu0  ;;  %v741_v51 = vpop.f32.mrb[6].mxu1  ;;  %4136 = vmatpush3.bf16.msra.mxu0 %v4427_v44  ;;  %4156 = vmatpush3.bf16.msra.mxu1 %v4428_v45 }
 0x19d   :  { %v3864_v54 = vpop.f32.mrb[7].mxu0  ;;  %v3884_v55 = vpop.f32.mrb[7].mxu1  ;;  %4137 = vmatprep.subr.bf16.mxu0 %v4550_v1  ;;  %4157 = vmatprep.subr.bf16.mxu1 %v4550_v1 }
 0x1a0   :  { %4138 = vmatpush3.bf16.msra.mxu0 %v4429_v52  ;;  %4158 = vmatpush3.bf16.msra.mxu1 %v4430_v53 }
 0x1a1   :  { %4139 = vmatprep.subr.bf16.mxu0 %v4550_v1  ;;  %4159 = vmatprep.subr.bf16.mxu1 %v4550_v1 }
 0x1a4   :  { %4140 = vmatpush3.bf16.msra.mxu0 %v4431_v56  ;;  %4160 = vmatpush3.bf16.msra.mxu1 %v4432_v57 }
 0x1a5   :  { %4165 = vmatprep.subr.bf16.mxu0 %v4550_v1  ;;  %4185 = vmatprep.subr.bf16.mxu1 %v4550_v1 }
 0x1a7   :  { %4142 = vmatmul.mubr.bf16.vlgmr.msra.gmra.mrb[32].mxu0 %v4706_v33  ;;  %4162 = vmatmul.mubr.bf16.vlgmr.msra.gmra.mrb[32].mxu1 %v4706_v33 }
 0x1a8   :  { %4166 = vmatpush3.bf16.msra.mxu0 %v4433_v58  ;;  %4186 = vmatpush3.bf16.msra.mxu1 %v4434_v59  ;;  %v4552_v58 = vmov 0   ;;  %v44_v59 = vld [vmem:[%s5660_s9] sm:$0xff] }
 0x1a9   :  { %4167 = vmatprep.subr.bf16.mxu0 %v4550_v1  ;;  %4187 = vmatprep.subr.bf16.mxu1 %v4550_v1 }
 0x1aa   :  { %4181 = vmatprep.mubr.msk.bf16.mxu0 %vm4551_vm0, %v4550_v1  ;;  %4201 = vmatprep.mubr.msk.bf16.mxu1 %vm4551_vm0, %v4550_v1 }
 0x1ab   :  { %4288 = vset.pattern.permute.xlu0 %v4552_v58 }
 0x1ac   :  { %4168 = vmatpush3.bf16.msra.mxu0 %v4435_v60  ;;  %4188 = vmatpush3.bf16.msra.mxu1 %v4436_v61  ;;  %v2152_v60 = vld [vmem:[%s5661_s7] sm:$0xff] }
 0x1ad   :  { %4169 = vmatprep.subr.bf16.mxu0 %v4550_v1  ;;  %4189 = vmatprep.subr.bf16.mxu1 %v4550_v1  ;;  %v5375_v61 = vld [vmem:[%s5662_s8] sm:$0xff] }
 0x1ae   :  { %47 = vperm.xlu0 %4288, %v44_v59  }
 0x1b0   :  { %4170 = vmatpush3.bf16.msra.mxu0 %v4437_v62  ;;  %4190 = vmatpush3.bf16.msra.mxu1 %v4438_v63 }
 0x1b1   :  { %4171 = vmatprep.subr.bf16.mxu0 %v4550_v1  ;;  %4191 = vmatprep.subr.bf16.mxu1 %v4550_v1 }
 0x1b4   :  { %4172 = vmatpush3.bf16.msra.mxu0 %v4439_v0  ;;  %4192 = vmatpush3.bf16.msra.mxu1 %v4440_v2  ;;  %v2154_v0 = vmul.f32 %v2152_v60, %v5174_v18  ;;  %v2155_v2 = vmul.f32 %v2152_v60, %v5176_v19  ;;  %v2157_v18 = vmul.f32 %v2152_v60, %v5250_v47 }
 0x1b5   :  { %4173 = vmatprep.subr.bf16.mxu0 %v4550_v1  ;;  %4193 = vmatprep.subr.bf16.mxu1 %v4550_v1 }
 0x1b8   :  { %4174 = vmatpush3.bf16.msra.mxu0 %v4441_v3  ;;  %4194 = vmatpush3.bf16.msra.mxu1 %v4442_v4 }
 0x1b9   :  { %4175 = vmatprep.subr.bf16.mxu0 %v4550_v1  ;;  %4195 = vmatprep.subr.bf16.mxu1 %v4550_v1 }
 0x1ba   :  { %v5322_v7 = vpop.f32.mrb[8].mxu0  ;;  %v5324_v8 = vpop.f32.mrb[8].mxu1 }
 0x1bb   :  { %v3903_v9 = vpop.f32.mrb[9].mxu0  ;;  %v3923_v10 = vpop.f32.mrb[9].mxu1 }
 0x1bc   :  { %v829_v11 = vpop.f32.mrb[10].mxu0  ;;  %v917_v12 = vpop.f32.mrb[10].mxu1  ;;  %4176 = vmatpush3.bf16.msra.mxu0 %v4443_v5  ;;  %4196 = vmatpush3.bf16.msra.mxu1 %v4444_v6 }
 0x1bd   :  { %v3904_v15 = vpop.f32.mrb[11].mxu0  ;;  %v3924_v16 = vpop.f32.mrb[11].mxu1  ;;  %4177 = vmatprep.subr.bf16.mxu0 %v4550_v1  ;;  %4197 = vmatprep.subr.bf16.mxu1 %v4550_v1 }
 0x1c0   :  { %4178 = vmatpush3.bf16.msra.mxu0 %v4445_v13  ;;  %4198 = vmatpush3.bf16.msra.mxu1 %v4446_v14 }
 0x1c1   :  { %4179 = vmatprep.subr.bf16.mxu0 %v4550_v1  ;;  %4199 = vmatprep.subr.bf16.mxu1 %v4550_v1 }
 0x1c4   :  { %4180 = vmatpush3.bf16.msra.mxu0 %v4447_v17  ;;  %4200 = vmatpush3.bf16.msra.mxu1 %v4448_v20  ;;  %v2156_v17 = vmul.f32 %v2152_v60, %v5248_v46  ;;  %v2167_v46 = vmul.f32 %v2152_v60, %v5324_v8 }
 0x1c5   :  { %4229 = vmatprep.subr.bf16.mxu0 %v4550_v1  ;;  %4205 = vmatprep.subr.bf16.mxu1 %v4550_v1 }
 0x1c7   :  { %4182 = vmatmul.mubr.bf16.vlgmr.msra.gmra.mrb[36].mxu0 %v4706_v33  ;;  %4202 = vmatmul.mubr.bf16.vlgmr.msra.gmra.mrb[36].mxu1 %v4706_v33 }
 0x1c8   :  { %4207 = vmatprep.mubr.msk.bf16.mxu1 %vm4551_vm0, %v4550_v1  ;;  %4231 = vmatprep.mubr.msk.bf16.mxu0 %vm4551_vm0, %v4550_v1 }
 0x1da   :  { %v5350_v22 = vpop.f32.mrb[12].mxu0  ;;  %v5352_v24 = vpop.f32.mrb[12].mxu1 }
 0x1db   :  { %v3943_v25 = vpop.f32.mrb[13].mxu0  ;;  %v3963_v27 = vpop.f32.mrb[13].mxu1  ;;  %v2169_v59 = vmul.f32 %v2152_v60, %v5352_v24 }
 0x1dc   :  { %v1005_v28 = vpop.f32.mrb[14].mxu0  ;;  %v1093_v29 = vpop.f32.mrb[14].mxu1 }
 0x1dd   :  { %v3944_v30 = vpop.f32.mrb[15].mxu0  ;;  %v3964_v31 = vpop.f32.mrb[15].mxu1 }
 0x1fa   :  { %v1178_v32 = vpop.f32.mrb[16].mxu0  ;;  %v1266_v34 = vpop.f32.mrb[16].mxu1 }
 0x1fb   :  { %v2422_v33 = vpack.c.bf16 %v1178_v32, %v1178_v32  ;;  %v2423_v35 = vpack.c.bf16 %v1266_v34, %v1266_v34  ;;  %v3983_v36 = vpop.f32.mrb[17].mxu0  ;;  %v4003_v37 = vpop.f32.mrb[17].mxu1 }
 0x1fc   :  { %v1181_v38 = vpop.f32.mrb[18].mxu0  ;;  %v1269_v39 = vpop.f32.mrb[18].mxu1  ;;  %v2166_v36 = vmul.f32 %v2152_v60, %v5322_v7 }
 0x1fd   :  { %v2431_v40 = vsel %vm2429_vm1, %v2422_v33, 0  ;;  %v5356_v41 = vsel %vm2429_vm1, %v2423_v35, 0  ;;  %v3984_v42 = vpop.f32.mrb[19].mxu0  ;;  %v4004_v43 = vpop.f32.mrb[19].mxu1 }
 0x1fe   :  { %4230 = vmatpush3.bf16.msra.mxu0 %v2431_v40 }
 0x1ff   :  { %4241 = vmatprep.subr.bf16.mxu0 %v4550_v1 }
 0x21a   :  { %v1354_v44 = vpop.f32.mrb[20].mxu0  ;;  %v1442_v45 = vpop.f32.mrb[20].mxu1 }
 0x21b   :  { %v2424_v48 = vpack.c.bf16 %v1354_v44, %v1354_v44  ;;  %v2425_v49 = vpack.c.bf16 %v1442_v45, %v1442_v45  ;;  %v4023_v50 = vpop.f32.mrb[21].mxu0  ;;  %v4043_v51 = vpop.f32.mrb[21].mxu1 }
 0x21c   :  { %v1357_v52 = vpop.f32.mrb[22].mxu0  ;;  %v1445_v53 = vpop.f32.mrb[22].mxu1 }
 0x21d   :  { %v5360_v54 = vsel %vm2429_vm1, %v2424_v48, 0  ;;  %v5363_v55 = vsel %vm2429_vm1, %v2425_v49, 0  ;;  %v4024_v56 = vpop.f32.mrb[23].mxu0  ;;  %v4044_v57 = vpop.f32.mrb[23].mxu1 }
 0x21e   :  { %v2168_v57 = vmul.f32 %v2152_v60, %v5350_v22 }
 0x23a   :  { %v1530_v62 = vpop.f32.mrb[24].mxu0  ;;  %v1618_v63 = vpop.f32.mrb[24].mxu1 }
 0x23b   :  { %v2158_v3 = vmul.f32 %v5375_v61, %v1530_v62  ;;  %v2159_v4 = vmul.f32 %v5375_v61, %v1618_v63  ;;  %v4063_v5 = vpop.f32.mrb[25].mxu0  ;;  %v4083_v6 = vpop.f32.mrb[25].mxu1 }
 0x23c   :  { %v1533_v9 = vpop.f32.mrb[26].mxu0  ;;  %v1621_v10 = vpop.f32.mrb[26].mxu1 }
 0x23d   :  { %v2162_v11 = vadd.f32 %v2158_v3, %v2154_v0  ;;  %v2163_v12 = vadd.f32 %v2159_v4, %v2155_v2  ;;  %v4064_v13 = vpop.f32.mrb[27].mxu0  ;;  %v4084_v14 = vpop.f32.mrb[27].mxu1 }
 0x23e   :  { %v43_v13 = vand.u32 127, %v40_v21  ;;  %v3344_v14 = vld [vmem:[%s5663_s10] ss:$0 sm:$0xff] }
 0x23f   :  { %v2178_v8 = vpack.c.bf16 %v2162_v11, %v2162_v11  ;;  %v2179_v52 = vpack.c.bf16 %v2163_v12, %v2163_v12 }
 0x240   :  { %vm54_vm3 = vcmp.le.s32.totalorder %v43_v13, %v4691_v23  ;;  %v4507_v23 = vld [vmem:[%s5667_s6 + $0x48] sm:$0xff]  }
 0x25a   :  { %v1706_v15 = vpop.f32.mrb[28].mxu0  ;;  %v1794_v16 = vpop.f32.mrb[28].mxu1 }
 0x25b   :  { %v2160_v19 = vmul.f32 %v5375_v61, %v1706_v15  ;;  %v2161_v20 = vmul.f32 %v5375_v61, %v1794_v16  ;;  %v4103_v25 = vpop.f32.mrb[29].mxu0  ;;  %v4123_v27 = vpop.f32.mrb[29].mxu1 }
 0x25c   :  { %v1709_v28 = vpop.f32.mrb[30].mxu0  ;;  %v1797_v29 = vpop.f32.mrb[30].mxu1 }
 0x25d   :  { %v2164_v30 = vadd.f32 %v2160_v19, %v2156_v17  ;;  %v2165_v31 = vadd.f32 %v2161_v20, %v2157_v18  ;;  %v4104_v32 = vpop.f32.mrb[31].mxu0  ;;  %v4124_v34 = vpop.f32.mrb[31].mxu1 }
 0x25e   :  { %v48_v15 = vpop.permute.xlu0 %47 }
 0x25f   :  { %v2180_v24 = vpack.c.bf16 %v2164_v30, %v2164_v30  ;;  %vm53_vm4 = vcmp.eq.s32.totalorder %v48_v15, %v3344_v14 }
 0x260   :  { %vm5420_vm5 = vmand %vm53_vm4, %vm54_vm3 }
 0x27a   :  { %v1882_v33 = vpop.f32.mrb[32].mxu0  ;;  %v1970_v35 = vpop.f32.mrb[32].mxu1 }
 0x27b   :  { %v2170_v47 = vmul.f32 %v5375_v61, %v1882_v33  ;;  %v2171_v37 = vmul.f32 %v5375_v61, %v1970_v35  ;;  %v4143_v38 = vpop.f32.mrb[33].mxu0  ;;  %v4163_v39 = vpop.f32.mrb[33].mxu1 }
 0x27c   :  { %v1885_v40 = vpop.f32.mrb[34].mxu0  ;;  %v1973_v42 = vpop.f32.mrb[34].mxu1 }
 0x27d   :  { %v2174_v43 = vadd.f32 %v2170_v47, %v2166_v36  ;;  %v2175_v44 = vadd.f32 %v2171_v37, %v2167_v46  ;;  %v4144_v45 = vpop.f32.mrb[35].mxu0  ;;  %v4164_v48 = vpop.f32.mrb[35].mxu1 }
 0x27f   :  { %v2182_v49 = vpack.c.bf16 %v2174_v43, %v2174_v43  ;;  %v2183_v7 = vpack.c.bf16 %v2175_v44, %v2175_v44 }
 0x281   :  { %v2191_v50 = vsel %vm2186_vm2, %v2182_v49, 0  ;;  %v2237_v51 = vsel %vm2186_vm2, %v2183_v7, 0 }
 0x282   :  { %4206 = vmatpush3.bf16.xpose.msra.mxu1 %v2191_v50 }
 0x283   :  { %4211 = vmatprep.subr.bf16.mxu1 %v4550_v1 }
 0x289   :  { %4208 = vmatmul.mubr.msk.bf16.vlgmr.msra.gmra.mrb[40].mxu1 %vm2186_vm2, %v2178_v8 }
 0x28a   :  { %4212 = vmatpush3.bf16.xpose.msra.mxu1 %v2237_v51  ;;  %4213 = vmatprep.mubr.msk.bf16.mxu1 %vm4551_vm0, %v4550_v1 }
 0x28b   :  { %4217 = vmatprep.subr.bf16.mxu1 %v4550_v1 }
 0x291   :  { %4214 = vmatmul.mubr.msk.bf16.vlgmr.msra.gmra.mrb[44].mxu1 %vm2186_vm2, %v2179_v52 }
 0x292   :  { %4219 = vmatprep.mubr.msk.bf16.mxu1 %vm4551_vm0, %v4550_v1 }
 0x29a   :  { %v2058_v53 = vpop.f32.mrb[36].mxu0  ;;  %v2146_v56 = vpop.f32.mrb[36].mxu1 }
 0x29b   :  { %v2172_v62 = vmul.f32 %v5375_v61, %v2058_v53  ;;  %v2173_v63 = vmul.f32 %v5375_v61, %v2146_v56  ;;  %v4183_v0 = vpop.f32.mrb[37].mxu0  ;;  %v4203_v2 = vpop.f32.mrb[37].mxu1  ;;  %v2181_v61 = vpack.c.bf16 %v2165_v31, %v2165_v31 }
 0x29c   :  { %v2061_v3 = vpop.f32.mrb[38].mxu0  ;;  %v2149_v4 = vpop.f32.mrb[38].mxu1 }
 0x29d   :  { %v2176_v5 = vadd.f32 %v2172_v62, %v2168_v57  ;;  %v2177_v6 = vadd.f32 %v2173_v63, %v2169_v59  ;;  %v4184_v9 = vpop.f32.mrb[39].mxu0  ;;  %v4204_v10 = vpop.f32.mrb[39].mxu1 }
 0x29f   :  { %v2184_v11 = vpack.c.bf16 %v2176_v5, %v2176_v5  ;;  %v2185_v22 = vpack.c.bf16 %v2177_v6, %v2177_v6 }
 0x2a1   :  { %v2283_v12 = vsel %vm2186_vm2, %v2184_v11, 0  ;;  %v2329_v60 = vsel %vm2186_vm2, %v2185_v22, 0  ;;  %v4449_v22 = vld [vmem:[%s5664_s4] sm:$0xff]  }
 0x2a2   :  { %4218 = vmatpush3.bf16.xpose.msra.mxu1 %v2283_v12 }
 0x2a3   :  { %4223 = vmatprep.subr.bf16.mxu1 %v4550_v1 }
 0x2a9   :  { %4220 = vmatmul.mubr.msk.bf16.vlgmr.msra.gmra.mrb[48].mxu1 %vm2186_vm2, %v2180_v24  ;;  %v4450_v24 = vld [vmem:[%s5664_s4 + $0x8] sm:$0xff]  }
 0x2aa   :  { %4224 = vmatpush3.bf16.xpose.msra.mxu1 %v2329_v60  ;;  %4225 = vmatprep.mubr.msk.bf16.mxu1 %vm4551_vm0, %v4550_v1  ;;  %v4451_v60 = vld [vmem:[%s5664_s4 + $0x10] sm:$0xff]  }
 0x2ab   :  { %4235 = vmatprep.subr.bf16.mxu1 %v4550_v1 }
 0x2b1   :  { %4226 = vmatmul.mubr.msk.bf16.vlgmr.msra.gmra.mrb[52].mxu1 %vm2186_vm2, %v2181_v61  ;;  %v4452_v61 = vld [vmem:[%s5664_s4 + $0x18] sm:$0xff]  }
 0x2b2   :  { %4236 = vmatpush3.bf16.msra.mxu1 %v5356_v41  ;;  %4237 = vmatprep.mubr.msk.bf16.mxu1 %vm4551_vm0, %v4550_v1 }
 0x2b3   :  { %4247 = vmatprep.subr.bf16.mxu1 %v4550_v1 }
 0x35c   :  { %v2227_v16 = vpop.f32.mrb[40].mxu1 }
 0x35d   :  { %v2371_v41 = vmul.f32 0.17677669, %v2227_v16  ;;  %v4209_v18 = vpop.f32.mrb[41].mxu1 }
 0x35e   :  { %v2230_v19 = vpop.f32.mrb[42].mxu1 }
 0x35f   :  { %v4210_v20 = vpop.f32.mrb[43].mxu1  ;;  %v2377_v21 = vsel %vm5420_vm5, %v2371_v41, -1e+30  ;;  %v4453_v19 = vld [vmem:[%s5664_s4 + $0x20] sm:$0xff]  }
 0x360   :  { %v2382_v25 = vsel %vm2381_vm6, %v2377_v21, -inf }
 0x361   :  { %2383 = vmax.xlane.f32.xlu1 %v2382_v25  ;;  %v4454_v25 = vld [vmem:[%s5664_s4 + $0x28] sm:$0xff]  }
 0x364   :  { %v2273_v27 = vpop.f32.mrb[44].mxu1 }
 0x365   :  { %v2372_v28 = vmul.f32 0.17677669, %v2273_v27  ;;  %v4215_v29 = vpop.f32.mrb[45].mxu1 }
 0x366   :  { %v2276_v30 = vpop.f32.mrb[46].mxu1 }
 0x367   :  { %v4216_v31 = vpop.f32.mrb[47].mxu1  ;;  %v2378_v32 = vsel %vm5420_vm5, %v2372_v28, -1e+30 }
 0x368   :  { %v2385_v34 = vsel %vm2381_vm6, %v2378_v32, -inf }
 0x369   :  { %2386 = vmax.xlane.f32.xlu1 %v2385_v34 }
 0x37c   :  { %v2319_v33 = vpop.f32.mrb[48].mxu1 }
 0x37d   :  { %v2373_v35 = vmul.f32 0.17677669, %v2319_v33  ;;  %v4221_v36 = vpop.f32.mrb[49].mxu1 }
 0x37e   :  { %v2322_v46 = vpop.f32.mrb[50].mxu1 }
 0x37f   :  { %v4222_v47 = vpop.f32.mrb[51].mxu1  ;;  %v2379_v37 = vsel %vm5420_vm5, %v2373_v35, -1e+30  ;;  %v4456_v35 = vld [vmem:[%s5664_s4 + $0x38] sm:$0xff]  }
 0x380   :  { %v2388_v38 = vsel %vm2381_vm6, %v2379_v37, -inf }
 0x381   :  { %2389 = vmax.xlane.f32.xlu1 %v2388_v38 }
 0x384   :  { %v2365_v39 = vpop.f32.mrb[52].mxu1 }
 0x385   :  { %v2374_v40 = vmul.f32 0.17677669, %v2365_v39  ;;  %v4227_v42 = vpop.f32.mrb[53].mxu1 }
 0x386   :  { %v2368_v43 = vpop.f32.mrb[54].mxu1 }
 0x387   :  { %v4228_v44 = vpop.f32.mrb[55].mxu1  ;;  %v2380_v45 = vsel %vm5420_vm5, %v2374_v40, -1e+30 }
 0x388   :  { %v2391_v48 = vsel %vm2381_vm6, %v2380_v45, -inf }
 0x389   :  { %2392 = vmax.xlane.f32.xlu1 %v2391_v48 }
 0x3ee   :  { %v2384_v49 = vpop.xlane.xlu1 %2383 }
 0x3ef   :  { %v2394_v50 = vsub.f32 %v2377_v21, %v2384_v49 }
 0x3f1   :  { %v2398_v7 = vmul.f32 1.442695, %v2394_v50 }
 0x3f3   :  { %4523 = vpow2.f32 %v2398_v7 }
 0x3f6   :  { %v2387_v8 = vpop.xlane.xlu1 %2386 }
 0x3f7   :  { %v2395_v51 = vsub.f32 %v2378_v32, %v2387_v8  ;;  %v4455_v32 = vld [vmem:[%s5664_s4 + $0x30] sm:$0xff]  }
 0x3f8   :  { %v4457_v8 = vld [vmem:[%s5665_s5] ss:$16 sps:$4 sm:$0xff]  }
 0x3f9   :  { %v2400_v52 = vmul.f32 1.442695, %v2395_v51  ;;  %v4459_v51 = vld [vmem:[%s5665_s5 + $0x4] ss:$16 sps:$4 sm:$0xff]  }
 0x3fb   :  { %4525 = vpow2.f32 %v2400_v52  ;;  %v4460_v52 = vld [vmem:[%s5665_s5 + $0x8] ss:$16 sps:$4 sm:$0xff]  }
 0x3fd   :  { %v4524_v53 = vpop.eup %4523 }
 0x3fe   :  { %v2406_v56 = vsel %vm2381_vm6, %v4524_v53, 0.0  ;;  %v2418_v57 = vpack.c.bf16 %v4524_v53, %v4524_v53  ;;  %v4462_v53 = vld [vmem:[%s5665_s5 + $0xc] ss:$16 sps:$4 sm:$0xff]  }
 0x3ff   :  { %2407 = vadd.xlane.f32.xlu1 %v2406_v56  ;;  %v4465_v56 = vld [vmem:[%s5665_s5 + $0x24] ss:$16 sps:$4 sm:$0xff]  }
 0x400   :  { %4232 = vmatmul.mubr.msk.bf16.vlgmr.msra.gmra.mrb[40].mxu0 %vm2381_vm6, %v2418_v57  ;;  %v4466_v57 = vld [vmem:[%s5665_s5 + $0x28] ss:$16 sps:$4 sm:$0xff]  }
 0x401   :  { %4242 = vmatpush3.bf16.msra.mxu0 %v5360_v54  ;;  %4243 = vmatprep.mubr.msk.bf16.mxu0 %vm4551_vm0, %v4550_v1 }
 0x402   :  { %4253 = vmatprep.subr.bf16.mxu0 %v4550_v1 }
 0x405   :  { %v4526_v59 = vpop.eup %4525 }
 0x406   :  { %v2409_v62 = vsel %vm2381_vm6, %v4526_v59, 0.0  ;;  %v2419_v63 = vpack.c.bf16 %v4526_v59, %v4526_v59  ;;  %v4468_v59 = vld [vmem:[%s5665_s5 + $0x2c] ss:$16 sps:$4 sm:$0xff]  }
 0x407   :  { %2410 = vadd.xlane.f32.xlu1 %v2409_v62  ;;  %v4469_v62 = vld [vmem:[%s5665_s5 + $0x40] ss:$16 sps:$4 sm:$0xff]  }
 0x408   :  { %4238 = vmatmul.mubr.msk.bf16.vlgmr.msra.gmra.mrb[56].mxu1 %vm2381_vm6, %v2419_v63  ;;  %v4471_v63 = vld [vmem:[%s5665_s5 + $0x44] ss:$16 sps:$4 sm:$0xff]  }
 0x409   :  { %4248 = vmatpush3.bf16.msra.mxu1 %v5363_v55  ;;  %4249 = vmatprep.mubr.msk.bf16.mxu1 %vm4551_vm0, %v4550_v1 }
 0x40a   :  { %4261 = vmatprep.subr.bf16.mxu1 %v4550_v1 }
 0x40e   :  { %v2390_v54 = vpop.xlane.xlu1 %2389 }
 0x40f   :  { %v2396_v0 = vsub.f32 %v2379_v37, %v2390_v54  ;;  %v4472_v54 = vld [vmem:[%s5665_s5 + $0x48] ss:$16 sps:$4 sm:$0xff]  }
 0x411   :  { %v2402_v2 = vmul.f32 1.442695, %v2396_v0  ;;  %v4474_v0 = vld [vmem:[%s5665_s5 + $0x4c] ss:$16 sps:$4 sm:$0xff]  }
 0x413   :  { %4527 = vpow2.f32 %v2402_v2 }
 0x416   :  { %v2393_v3 = vpop.xlane.xlu1 %2392 }
 0x417   :  { %v2397_v4 = vsub.f32 %v2380_v45, %v2393_v3 }
 0x419   :  { %v2404_v5 = vmul.f32 1.442695, %v2397_v4 }
 0x41b   :  { %4529 = vpow2.f32 %v2404_v5 }
 0x41d   :  { %v4528_v6 = vpop.eup %4527 }
 0x41e   :  { %v2412_v9 = vsel %vm2381_vm6, %v4528_v6, 0.0  ;;  %v2420_v10 = vpack.c.bf16 %v4528_v6, %v4528_v6 }
 0x41f   :  { %2413 = vadd.xlane.f32.xlu1 %v2412_v9 }
 0x420   :  { %4244 = vmatmul.mubr.msk.bf16.vlgmr.msra.gmra.mrb[44].mxu0 %vm2381_vm6, %v2420_v10 }
 0x421   :  { %4257 = vmatprep.mubr.msk.bf16.mxu0 %vm4551_vm0, %v4550_v1  ;;  %4254 = vmatpush3.bf16.msra.mxu0 %v4449_v22 }
 0x422   :  { %4255 = vmatprep.subr.bf16.mxu0 %v4550_v1 }
 0x425   :  { %v4530_v55 = vpop.eup %4529  ;;  %4256 = vmatpush3.bf16.msra.mxu0 %v4450_v24 }
 0x426   :  { %v2415_v11 = vsel %vm2381_vm6, %v4530_v55, 0.0  ;;  %v2421_v12 = vpack.c.bf16 %v4530_v55, %v4530_v55  ;;  %4269 = vmatprep.subr.bf16.mxu0 %v4550_v1 }
 0x427   :  { %2416 = vadd.xlane.f32.xlu1 %v2415_v11 }
 0x428   :  { %4250 = vmatmul.mubr.msk.bf16.vlgmr.msra.gmra.mrb[60].mxu1 %vm2381_vm6, %v2421_v12 }
 0x429   :  { %4265 = vmatprep.mubr.msk.bf16.mxu1 %vm4551_vm0, %v4550_v1  ;;  %4262 = vmatpush3.bf16.msra.mxu1 %v4451_v60 }
 0x42a   :  { %4263 = vmatprep.subr.bf16.mxu1 %v4550_v1 }
 0x42d   :  { %4264 = vmatpush3.bf16.msra.mxu1 %v4452_v61 }
 0x42e   :  { %4277 = vmatprep.subr.bf16.mxu1 %v4550_v1 }
 0x48c   :  { %v2408_v13 = vpop.xlane.xlu1 %2407 }
 0x48d   :  { %4531 = vrcp.f32 %v2408_v13 }
 0x494   :  { %v2411_v14 = vpop.xlane.xlu1 %2410 }
 0x495   :  { %4533 = vrcp.f32 %v2411_v14 }
 0x497   :  { %v4532_v15 = vpop.eup %4531 }
 0x49f   :  { %v4534_v27 = vpop.eup %4533 }
 0x4ac   :  { %v2414_v36 = vpop.xlane.xlu1 %2413 }
 0x4ad   :  { %4535 = vrcp.f32 %v2414_v36  ;;  %v4495_v36 = vld [vmem:[%s5665_s5 + $0xc4] ss:$16 sps:$4 sm:$0xff]  }
 0x4b4   :  { %v2417_v46 = vpop.xlane.xlu1 %2416 }
 0x4b5   :  { %4537 = vrcp.f32 %v2417_v46  ;;  %v4498_v46 = vld [vmem:[%s5665_s5 + $0xcc] ss:$16 sps:$4 sm:$0xff]  }
 0x4b7   :  { %v4536_v47 = vpop.eup %4535 }
 0x4bf   :  { %v4538_v44 = vpop.eup %4537 }
 0x4d3   :  { %v2467_v16 = vpop.f32.mrb[40].mxu0 }
 0x4d4   :  { %v2615_v17 = vmul.f32 %v4532_v15, %v2467_v16  ;;  %v4233_v41 = vpop.f32.mrb[41].mxu0 }
 0x4d5   :  { %v2470_v18 = vpop.f32.mrb[42].mxu0 }
 0x4d6   :  { %v2619_v20 = vpack.c.bf16 %v2615_v17, %v2615_v17  ;;  %v4234_v21 = vpop.f32.mrb[43].mxu0  ;;  %v4549_v17 = vld [vmem:[%s5657_s0] sm:$0xff] }
 0x4d7   :  { %v4480_v21 = vld [vmem:[%s5665_s5 + $0x6c] ss:$16 sps:$4 sm:$0xff]  }
 0x4d8   :  { %4258 = vmatmul.mubr.msk.bf16.vlgmr.msra.gmra.mrb[48].mxu0 %vm2186_vm2, %v2619_v20  ;;  %v4477_v20 = vld [vmem:[%s5665_s5 + $0x64] ss:$16 sps:$4 sm:$0xff]  }
 0x4d9   :  { %4270 = vmatpush3.bf16.msra.mxu0 %v4453_v19  ;;  %4273 = vmatprep.mubr.msk.bf16.mxu0 %vm4551_vm0, %v4550_v1 }
 0x4da   :  { %4271 = vmatprep.subr.bf16.mxu0 %v4550_v1 }
 0x4db   :  { %v2513_v28 = vpop.f32.mrb[56].mxu1 }
 0x4dc   :  { %v2616_v29 = vmul.f32 %v4534_v27, %v2513_v28  ;;  %v4239_v30 = vpop.f32.mrb[57].mxu1  ;;  %v4478_v27 = vld [vmem:[%s5665_s5 + $0x68] ss:$16 sps:$4 sm:$0xff]   ;;  %v4481_v28 = vld [vmem:[%s5665_s5 + $0x80] ss:$16 sps:$4 sm:$0xff]  }
 0x4dd   :  { %v2516_v31 = vpop.f32.mrb[58].mxu1  ;;  %4272 = vmatpush3.bf16.msra.mxu0 %v4454_v25  ;;  %v4475_v25 = vld [vmem:[%s5665_s5 + $0x60] ss:$16 sps:$4 sm:$0xff]   ;;  %v4484_v30 = vld [vmem:[%s5665_s5 + $0x88] ss:$16 sps:$4 sm:$0xff]  }
 0x4de   :  { %v2620_v34 = vpack.c.bf16 %v2616_v29, %v2616_v29  ;;  %v4240_v33 = vpop.f32.mrb[59].mxu1  ;;  %3070 = vmatprep.subr.bf16.mxu0 %v4459_v51  ;;  %v4483_v29 = vld [vmem:[%s5665_s5 + $0x84] ss:$16 sps:$4 sm:$0xff]   ;;  %v4486_v31 = vld [vmem:[%s5665_s5 + $0x8c] ss:$16 sps:$4 sm:$0xff]  }
 0x4df   :  { %v4487_v33 = vld [vmem:[%s5665_s5 + $0xa0] ss:$16 sps:$4 sm:$0xff]  }
 0x4e0   :  { %4266 = vmatmul.mubr.msk.bf16.vlgmr.msra.gmra.mrb[64].mxu1 %vm2186_vm2, %v2620_v34  ;;  %v4492_v34 = vld [vmem:[%s5665_s5 + $0xac] ss:$16 sps:$4 sm:$0xff]  }
 0x4e1   :  { %4278 = vmatpush3.bf16.msra.mxu1 %v4455_v32  ;;  %4281 = vmatprep.mubr.msk.bf16.mxu1 %vm4551_vm0, %v4550_v1  ;;  %v4489_v32 = vld [vmem:[%s5665_s5 + $0xa4] ss:$16 sps:$4 sm:$0xff]  }
 0x4e2   :  { %4279 = vmatprep.subr.bf16.mxu1 %v4550_v1 }
 0x4e5   :  { %4280 = vmatpush3.bf16.msra.mxu1 %v4456_v35  ;;  %v4490_v35 = vld [vmem:[%s5665_s5 + $0xa8] ss:$16 sps:$4 sm:$0xff]  }
 0x4e6   :  { %3111 = vmatprep.subr.bf16.mxu1 %v4462_v53  ;;  %v4506_v53 = vld [vmem:[%s5667_s6] sm:$0xff]  }
 0x4f3   :  { %v2559_v37 = vpop.f32.mrb[44].mxu0 }
 0x4f4   :  { %v2617_v38 = vmul.f32 %v4536_v47, %v2559_v37  ;;  %v4245_v39 = vpop.f32.mrb[45].mxu0  ;;  %v4493_v47 = vld [vmem:[%s5665_s5 + $0xc0] ss:$16 sps:$4 sm:$0xff]   ;;  %v4496_v37 = vld [vmem:[%s5665_s5 + $0xc8] ss:$16 sps:$4 sm:$0xff]  }
 0x4f5   :  { %v2562_v40 = vpop.f32.mrb[46].mxu0  ;;  %v4504_v39 = vld [vmem:[%s5665_s5 + $0xec] ss:$16 sps:$4 sm:$0xff]  }
 0x4f6   :  { %v2621_v42 = vpack.c.bf16 %v2617_v38, %v2617_v38  ;;  %v4246_v43 = vpop.f32.mrb[47].mxu0  ;;  %v4501_v38 = vld [vmem:[%s5665_s5 + $0xe4] ss:$16 sps:$4 sm:$0xff]   ;;  %v4499_v40 = vld [vmem:[%s5665_s5 + $0xe0] ss:$16 sps:$4 sm:$0xff]  }
 0x4f8   :  { %4274 = vmatmul.mubr.msk.bf16.vlgmr.msra.gmra.mrb[52].mxu0 %vm2186_vm2, %v2621_v42  ;;  %v4502_v42 = vld [vmem:[%s5665_s5 + $0xe8] ss:$16 sps:$4 sm:$0xff]  }
 0x4f9   :  { %3102 = vmatprep.mubr.bf16.mxu0 %v4552_v58  ;;  %3071 = vmatpush1.bf16.msra.mxu0 %v4457_v8 }
 0x4fa   :  { %3072 = vmatprep.subr.bf16.mxu0 %v4465_v56  ;;  %v4510_v56 = vld [vmem:[%s5667_s6 + $0x10] sm:$0xff]  }
 0x4fb   :  { %v2605_v45 = vpop.f32.mrb[60].mxu1 }
 0x4fc   :  { %v2618_v48 = vmul.f32 %v4538_v44, %v2605_v45  ;;  %v4251_v1 = vpop.f32.mrb[61].mxu1 }
 0x4fd   :  { %v2608_v49 = vpop.f32.mrb[62].mxu1 }
 0x4fe   :  { %v2622_v50 = vpack.c.bf16 %v2618_v48, %v2618_v48  ;;  %v4252_v7 = vpop.f32.mrb[63].mxu1  ;;  %v2863_v48 = vld [vmem:[%s5666_s2] sm:$0x1] }
 0x4ff   :  { %v2864_v1 = vunpack.c.l.bf16 %v2863_v48 }
 0x500   :  { %4282 = vmatmul.mubr.msk.bf16.vlgmr.msra.gmra.mrb[68].mxu1 %vm2186_vm2, %v2622_v50 }
 0x501   :  { %3143 = vmatprep.mubr.bf16.mxu1 %v4552_v58  ;;  %v4463_v58 = vld [vmem:[%s5665_s5 + $0x20] ss:$16 sps:$4 sm:$0xff]   ;;  %3112 = vmatpush1.bf16.msra.mxu1 %v4460_v52  ;;  %v2875_v49 = vrot.slane %v2864_v1, %v68_v26  ;;  %v4508_v26 = vld [vmem:[%s5667_s6 + $0x8] sm:$0xff]  }
 0x502   :  { %3113 = vmatprep.subr.bf16.mxu1 %v4468_v59  ;;  %3073 = vmatpush1.bf16.msra.mxu0 %v4463_v58  ;;  %v4505_v52 = vld [vmem:[%s5667_s6 + $0x40] sm:$0xff]   ;;  %v4509_v58 = vld [vmem:[%s5667_s6 + $0x50] sm:$0xff]   ;;  %v4512_v59 = vld [vmem:[%s5667_s6 + $0x18] sm:$0xff]  }
 0x503   :  { %3074 = vmatprep.subr.bf16.mxu0 %v4471_v63  ;;  %v4514_v63 = vld [vmem:[%s5667_s6 + $0x20] sm:$0xff]  }
 0x505   :  { %3114 = vmatpush1.bf16.msra.mxu1 %v4466_v57  ;;  %v4511_v57 = vld [vmem:[%s5667_s6 + $0x58] sm:$0xff]  }
 0x506   :  { %3115 = vmatprep.subr.bf16.mxu1 %v4474_v0  ;;  %3075 = vmatpush1.bf16.msra.mxu0 %v4469_v62  ;;  %v4513_v62 = vld [vmem:[%s5667_s6 + $0x60] sm:$0xff]   ;;  %v4516_v0 = vld [vmem:[%s5667_s6 + $0x28] sm:$0xff]  }
 0x507   :  { %3076 = vmatprep.subr.bf16.mxu0 %v4477_v20 }
 0x509   :  { %3116 = vmatpush1.bf16.msra.mxu1 %v4472_v54  ;;  %v4515_v54 = vld [vmem:[%s5667_s6 + $0x68] sm:$0xff]  }
 0x50a   :  { %3117 = vmatprep.subr.bf16.mxu1 %v4480_v21  ;;  %3077 = vmatpush1.bf16.msra.mxu0 %v4475_v25 }
 0x50b   :  { %3078 = vmatprep.subr.bf16.mxu0 %v4483_v29 }
 0x50d   :  { %3118 = vmatpush1.bf16.msra.mxu1 %v4478_v27 }
 0x50e   :  { %3119 = vmatprep.subr.bf16.mxu1 %v4486_v31  ;;  %3079 = vmatpush1.bf16.msra.mxu0 %v4481_v28 }
 0x50f   :  { %3080 = vmatprep.subr.bf16.mxu0 %v4489_v32 }
 0x511   :  { %3120 = vmatpush1.bf16.msra.mxu1 %v4484_v30 }
 0x512   :  { %3121 = vmatprep.subr.bf16.mxu1 %v4492_v34  ;;  %3081 = vmatpush1.bf16.msra.mxu0 %v4487_v33 }
 0x513   :  { %3082 = vmatprep.subr.bf16.mxu0 %v4495_v36 }
 0x515   :  { %3122 = vmatpush1.bf16.msra.mxu1 %v4490_v35 }
 0x516   :  { %3123 = vmatprep.subr.bf16.mxu1 %v4498_v46  ;;  %3083 = vmatpush1.bf16.msra.mxu0 %v4493_v47 }
 0x517   :  { %3084 = vmatprep.subr.bf16.mxu0 %v4501_v38 }
 0x519   :  { %3124 = vmatpush1.bf16.msra.mxu1 %v4496_v37 }
 0x51a   :  { %3125 = vmatprep.subr.bf16.mxu1 %v4504_v39  ;;  %3085 = vmatpush1.bf16.msra.mxu0 %v4499_v40 }
 0x51b   :  { %3783 = vmatprep.subr.bf16.mxu0 %v4505_v52 }
 0x51d   :  { %3126 = vmatpush1.bf16.msra.mxu1 %v4502_v42 }
 0x5ab   :  { %v2688_v2 = vpop.f32.mrb[48].mxu0 }
 0x5ac   :  { %v4259_v3 = vpop.f32.mrb[49].mxu0 }
 0x5ad   :  { %v2691_v4 = vpop.f32.mrb[50].mxu0  ;;  %v4518_v3 = vld [vmem:[%s5667_s6 + $0x30] sm:$0xff]  }
 0x5ae   :  { %v4260_v5 = vpop.f32.mrb[51].mxu0  ;;  %v4519_v4 = vld [vmem:[%s5667_s6 + $0x78] sm:$0xff]  }
 0x5af   :  { %v4520_v5 = vld [vmem:[%s5667_s6 + $0x38] sm:$0xff]  }
 0x5b3   :  { %v2743_v6 = vpop.f32.mrb[64].mxu1 }
 0x5b4   :  { %v2859_v9 = vadd.f32 %v2743_v6, %v2688_v2  ;;  %v4267_v10 = vpop.f32.mrb[65].mxu1  ;;  %v4517_v2 = vld [vmem:[%s5667_s6 + $0x70] sm:$0xff]  }
 0x5b5   :  { %v2746_v55 = vpop.f32.mrb[66].mxu1 }
 0x5b6   :  { %v4268_v11 = vpop.f32.mrb[67].mxu1 }
 0x5cb   :  { %v2798_v12 = vpop.f32.mrb[52].mxu0 }
 0x5cc   :  { %v2860_v22 = vadd.f32 %v2859_v9, %v2798_v12  ;;  %v4275_v24 = vpop.f32.mrb[53].mxu0 }
 0x5cd   :  { %v2801_v60 = vpop.f32.mrb[54].mxu0 }
 0x5ce   :  { %v4276_v61 = vpop.f32.mrb[55].mxu0 }
 0x5d3   :  { %v2853_v13 = vpop.f32.mrb[68].mxu1 }
 0x5d4   :  { %v2861_v14 = vadd.f32 %v2860_v22, %v2853_v13  ;;  %v4283_v15 = vpop.f32.mrb[69].mxu1 }
 0x5d5   :  { %v2856_v16 = vpop.f32.mrb[70].mxu1 }
 0x5d6   :  { %v5535_v41 = vadd.f32 %v4549_v17, %v2861_v14  ;;  %v4284_v18 = vpop.f32.mrb[71].mxu1 }
 0x5d8   :  { %v2865_v19 = vmul.f32 %v5535_v41, %v5535_v41 }
 0x5da   :  { %2866 = vadd.xlane.f32.xlu1 %v2865_v19 }
 0x667   :  { %v2867_v43 = vpop.xlane.xlu1 %2866 }
 0x668   :  { %v2868_v44 = vmul.f32 0.0078125, %v2867_v43 }
 0x66a   :  { %v2869_v45 = vadd.f32 1e-06, %v2868_v44 }
 0x66c   :  { %4539 = vrsqrt.f32 %v2869_v45 }
 0x676   :  { %v4540_v50 = vpop.eup %4539 }
 0x677   :  { %v2871_v7 = vmul.f32 %v4540_v50, %v5535_v41 }
 0x679   :  { %v2876_v8 = vmul.f32 %v2875_v49, %v2871_v7 }
 0x67b   :  { %v2877_v51 = vpack.c.bf16 %v2876_v8, %v2876_v8 }
 0x67d   :  { %3103 = vmatmul.mubr.bf16.vlgmr.msra.gmra.mrb[56].mxu0 %v2877_v51  ;;  %3144 = vmatmul.mubr.bf16.vlgmr.msra.gmra.mrb[72].mxu1 %v2877_v51 }
 0x67e   :  { %3784 = vmatpush3.bf16.msra.mxu0 %v4506_v53 }
 0x67f   :  { %3785 = vmatprep.subr.bf16.mxu0 %v4507_v23 }
 0x682   :  { %3786 = vmatpush3.bf16.msra.mxu0 %v4508_v26 }
 0x683   :  { %3787 = vmatprep.subr.bf16.mxu0 %v4509_v58 }
 0x686   :  { %3788 = vmatpush3.bf16.msra.mxu0 %v4510_v56 }
 0x687   :  { %3789 = vmatprep.subr.bf16.mxu0 %v4511_v57 }
 0x68a   :  { %3790 = vmatpush3.bf16.msra.mxu0 %v4512_v59 }
 0x68b   :  { %3791 = vmatprep.subr.bf16.mxu0 %v4513_v62 }
 0x68e   :  { %3792 = vmatpush3.bf16.msra.mxu0 %v4514_v63 }
 0x68f   :  { %3793 = vmatprep.subr.bf16.mxu0 %v4515_v54 }
 0x692   :  { %3794 = vmatpush3.bf16.msra.mxu0 %v4516_v0 }
 0x693   :  { %3795 = vmatprep.subr.bf16.mxu0 %v4517_v2 }
 0x696   :  { %3796 = vmatpush3.bf16.msra.mxu0 %v4518_v3 }
 0x697   :  { %3797 = vmatprep.subr.bf16.mxu0 %v4519_v4 }
 0x69a   :  { %3798 = vmatpush3.bf16.msra.mxu0 %v4520_v5 }
 0x750   :  { %v3104_v6 = vpop.f32.mrb[56].mxu0  ;;  %v3145_v9 = vpop.f32.mrb[72].mxu1 }
 0x751   :  { %v3557_v10 = vmul.f32 -1.442695, %v3104_v6  ;;  %v3106_v55 = vpop.f32.mrb[57].mxu0  ;;  %v3147_v11 = vpop.f32.mrb[73].mxu1 }
 0x752   :  { %v3558_v12 = vmul.f32 -1.442695, %v3106_v55  ;;  %v3108_v22 = vpop.f32.mrb[58].mxu0  ;;  %v3149_v24 = vpop.f32.mrb[74].mxu1 }
 0x753   :  { %4541 = vpow2.f32 %v3557_v10  ;;  %v3109_v60 = vpop.f32.mrb[59].mxu0  ;;  %v3150_v61 = vpop.f32.mrb[75].mxu1 }
 0x754   :  { %4543 = vpow2.f32 %v3558_v12 }
 0x75d   :  { %v4542_v13 = vpop.eup %4541 }
 0x75e   :  { %v4544_v14 = vpop.eup %4543  ;;  %v3158_v15 = vadd.f32 1.0, %v4542_v13 }
 0x75f   :  { %v3159_v16 = vadd.f32 1.0, %v4544_v14 }
 0x760   :  { %4545 = vrcp.f32 %v3158_v15 }
 0x761   :  { %4547 = vrcp.f32 %v3159_v16 }
 0x76a   :  { %v4546_v17 = vpop.eup %4545 }
 0x76b   :  { %v4548_v18 = vpop.eup %4547  ;;  %v3164_v19 = vmul.f32 %v4546_v17, %v3104_v6 }
 0x76c   :  { %v3165_v20 = vmul.f32 %v4548_v18, %v3106_v55 }
 0x76d   :  { %v3166_v21 = vmul.f32 %v3164_v19, %v3145_v9 }
 0x76e   :  { %v3167_v25 = vmul.f32 %v3165_v20, %v3147_v11 }
 0x76f   :  { %v3168_v28 = vpack.c.bf16 %v3166_v21, %v3166_v21 }
 0x770   :  { %v3169_v27 = vpack.c.bf16 %v3167_v25, %v3167_v25 }
 0x772   :  { %3330 = vmatprep.mubr.bf16.mxu0 %v3169_v27 }
 0x773   :  { %3331 = vmatmul.mubr.bf16.vlgmr.msra.gmra.mrb[60].mxu0 %v3168_v28 }
 0x846   :  { %v3799_v29 = vpop.f32.mrb[60].mxu0 }
 0x847   :  { %v3800_v30 = vpop.f32.mrb[61].mxu0 }
 0x848   :  { %v3801_v31 = vadd.f32 %v3800_v30, %v3799_v29  ;;  %v3802_v32 = vpop.f32.mrb[62].mxu0 }
 0x849   :  { %v3803_v34 = vpop.f32.mrb[63].mxu0 }
 0x84a   :  { %v3338_v33 = vadd.f32 %v3801_v31, %v5535_v41 }
 0x84c   :  { %3339 = vst [vmem:[%s5668_s11] sm:$0xff] %v3338_v33 }

</bundles_post_ra>
